<compile_context>
chip_gen: v7x
topology: tpu7x:2x2x1
jax: 0.10.0
libtpu: 0.0.40
codegen_flags: <defaults>
</compile_context>

<pallas_src>
import functools

import jax
import jax.numpy as jnp
from jax.experimental import pallas as pl
from jax.experimental.pallas import tpu as pltpu

IN_FEATURES = 204   # fixed by the module
HIDDEN_PAD = 256    # 204 -> 256: aligned fc1 output / fc2 contraction


def _round_up(x, m):
    return (x + m - 1) // m * m


def prepare_params(w1, b1, w2, b2, *, hidden_pad=HIDDEN_PAD):
    """One-time conversion of PyTorch-layout weights ([out, in]) into padded,
    pre-transposed kernel operands.  Zero padding of the hidden dim is exact:
    h[:, 204:] = ReLU(0 + 0) = 0 and the corresponding W2 rows are zero."""
    in_f = w1.shape[1]
    hid = w1.shape[0]
    code_len = w2.shape[0]
    w1_p = jnp.zeros((in_f, hidden_pad), jnp.float32).at[:, :hid].set(
        w1.T.astype(jnp.float32))
    b1_p = jnp.zeros((1, hidden_pad), jnp.float32).at[0, :hid].set(
        b1.astype(jnp.float32))
    w2_p = jnp.zeros((hidden_pad, code_len), jnp.float32).at[:w2.shape[1], :].set(
        w2.T.astype(jnp.float32))
    b2_p = b2.astype(jnp.float32).reshape(1, code_len)
    return w1_p, b1_p, w2_p, b2_p


def _mlp_kernel(x_ref, w1_ref, b1_ref, w2_ref, b2_ref, o_ref):
    # fc1: x @ W1 + b1 -> ReLU  (MXU, f32 accumulation; ragged K=204 is exact)
    h = jnp.dot(x_ref[...], w1_ref[...],
                precision=jax.lax.Precision.HIGHEST,
                preferred_element_type=jnp.float32) + b1_ref[...]
    h = jnp.maximum(h, 0.0)
    # fc2: h @ W2 + b2 -> Tanh  (aligned 256 contraction; tanh on the EUP)
    o = jnp.dot(h, w2_ref[...],
                precision=jax.lax.Precision.HIGHEST,
                preferred_element_type=jnp.float32) + b2_ref[...]
    o_ref[...] = jnp.tanh(o).astype(o_ref.dtype)


def _choose_tm(n, block_m):
    """Rows per grid step: multiple of 8, capped by block_m, and small enough
    to give >= 2 grid steps whenever possible (v7x has 2 TensorCores)."""
    tm = min(block_m, _round_up(max(n, 8), 8))
    if n > 8:
        tm = min(tm, _round_up(pl.cdiv(n, 2), 8))
    return max(tm, 8)


def linear_forward(x, w1_p, b1_p, w2_p, b2_p, *, block_m=1024):
    """Forward pass: x [N, 204] f32, prepared params from prepare_params().
    Returns [N, code_len] f32."""
    n, k = x.shape
    assert k == w1_p.shape[0], (k, w1_p.shape)
    h_pad = w1_p.shape[1]
    code_len = w2_p.shape[1]

    tm = _choose_tm(n, block_m)
    grid = (pl.cdiv(n, tm),)

    cost = pl.CostEstimate(
        flops=2 * n * (k * h_pad + h_pad * code_len),
        transcendentals=n * code_len,
        bytes_accessed=4 * (x.size + w1_p.size + b1_p.size + w2_p.size
                            + b2_p.size + n * code_len),
    )

    # Per-step VMEM: x (2 bufs) + out (2 bufs) + h intermediate + resident
    # weights/biases.  ~3 MiB at tm=1024 — fits every generation's scoped
    # default; only raise the limit if a caller pushes block_m much higher.
    step_bytes = 4 * (2 * tm * k + 2 * tm * code_len + tm * h_pad
                      + k * h_pad + h_pad * code_len + h_pad + code_len)
    cp_kwargs = dict(dimension_semantics=("parallel",))
    if step_bytes > (12 << 20):          # headroom vs v5e's 16 MiB default
        cp_kwargs["vmem_limit_bytes"] = min(step_bytes + (8 << 20), 100 << 20)

    out = pl.pallas_call(
        _mlp_kernel,
        out_shape=jax.ShapeDtypeStruct((n, code_len), jnp.float32),
        grid=grid,
        in_specs=[
            pl.BlockSpec((tm, k), lambda i: (i, 0)),            # x row tile (pipelined)
            pl.BlockSpec((k, h_pad), lambda i: (0, 0)),         # W1 (VMEM-resident)
            pl.BlockSpec((1, h_pad), lambda i: (0, 0)),         # b1 (VMEM-resident)
            pl.BlockSpec((h_pad, code_len), lambda i: (0, 0)),  # W2 (VMEM-resident)
            pl.BlockSpec((1, code_len), lambda i: (0, 0)),      # b2 (VMEM-resident)
        ],
        out_specs=pl.BlockSpec((tm, code_len), lambda i: (i, 0)),
        compiler_params=pltpu.CompilerParams(**cp_kwargs),
        cost_estimate=cost,
    )(x, w1_p, b1_p, w2_p, b2_p)
    return out


if __name__ == "__main__":
    key = jax.random.PRNGKey(0)
    code_len = 32
    batch = 20   # not a multiple of the row tile -> exercises the ragged tile

    kx, k1, k2, k3, k4 = jax.random.split(key, 5)
    bound = 1.0 / float(jnp.sqrt(jnp.float32(IN_FEATURES)))
    x = jax.random.normal(kx, (batch, IN_FEATURES), jnp.float32)
    # PyTorch nn.Linear convention: weight [out, in], bias [out].
    w1 = jax.random.uniform(k1, (IN_FEATURES, IN_FEATURES), jnp.float32,
                            -bound, bound)
    b1 = jax.random.uniform(k2, (IN_FEATURES,), jnp.float32, -bound, bound)
    w2 = jax.random.uniform(k3, (code_len, IN_FEATURES), jnp.float32,
                            -bound, bound)
    b2 = jax.random.uniform(k4, (code_len,), jnp.float32, -bound, bound)

    # "Module init": pad/transpose weights once, reuse on every forward.
    params = jax.block_until_ready(prepare_params(w1, b1, w2, b2))

    out = linear_forward(x, *params)
    out = jax.block_until_ready(out)

    # Reference in plain JAX, same math / same pinned precision.
    hp = jax.lax.Precision.HIGHEST
    ref_h = jnp.maximum(jnp.dot(x, w1.T, precision=hp) + b1, 0.0)
    ref = jnp.tanh(jnp.dot(ref_h, w2.T, precision=hp) + b2)

    assert out.shape == (batch, code_len)
    assert jnp.allclose(out, ref, atol=1e-5, rtol=1e-5), \
        float(jnp.max(jnp.abs(out - ref)))

    print("KERNEL_OK")
</pallas_src>

<mosaic_0001>
module attributes {stable_mosaic.version = 11 : i64} {
  func.func @_mlp_kernel(%arg0: i32, %arg1: memref<16x204xf32, #tpu.memory_space<vmem>>, %arg2: memref<204x256xf32, #tpu.memory_space<vmem>>, %arg3: memref<1x256xf32, #tpu.memory_space<vmem>>, %arg4: memref<256x32xf32, #tpu.memory_space<vmem>>, %arg5: memref<1x32xf32, #tpu.memory_space<vmem>>, %arg6: memref<16x32xf32, #tpu.memory_space<vmem>>) attributes {dimension_semantics = [#tpu.dimension_semantics<parallel>], iteration_bounds = array<i64: 2>, scalar_prefetch = 0 : i64, scratch_operands = 0 : i64, tpu.core_type = #tpu.core_type<tc>, window_params = [{transform_indices = @transform_0, window_bounds = array<i64: 16, 204>}, {pipeline_mode = #tpu.pipeline_mode<synchronous>, transform_indices = @transform_1, window_bounds = array<i64: 204, 256>}, {pipeline_mode = #tpu.pipeline_mode<synchronous>, transform_indices = @transform_2, window_bounds = array<i64: 1, 256>}, {pipeline_mode = #tpu.pipeline_mode<synchronous>, transform_indices = @transform_3, window_bounds = array<i64: 256, 32>}, {pipeline_mode = #tpu.pipeline_mode<synchronous>, transform_indices = @transform_4, window_bounds = array<i64: 1, 32>}, {transform_indices = @transform_5, window_bounds = array<i64: 16, 32>}]} {
    %c0 = arith.constant 0 : index
    %c0_0 = arith.constant 0 : index
    %0 = vector.load %arg1[%c0, %c0_0] : memref<16x204xf32, #tpu.memory_space<vmem>>, vector<16x204xf32>
    %c0_1 = arith.constant 0 : index
    %c0_2 = arith.constant 0 : index
    %1 = vector.load %arg2[%c0_1, %c0_2] : memref<204x256xf32, #tpu.memory_space<vmem>>, vector<204x256xf32>
    %cst = arith.constant dense<0.000000e+00> : vector<16x256xf32>
    %2 = tpu.matmul %0, %1, %cst {dimension_numbers = #tpu.dot_dimension_numbers<[1], [0], [0], [1], [0, 0, 1, 1], [], []>, precision = #tpu.contract_precision<fp32>} : vector<16x204xf32>, vector<204x256xf32>, vector<16x256xf32> -> vector<16x256xf32>
    %c0_3 = arith.constant 0 : index
    %c0_4 = arith.constant 0 : index
    %3 = vector.load %arg3[%c0_3, %c0_4] : memref<1x256xf32, #tpu.memory_space<vmem>>, vector<1x256xf32>
    %4 = vector.broadcast %3 : vector<1x256xf32> to vector<16x256xf32>
    %5 = arith.addf %2, %4 : vector<16x256xf32>
    %cst_5 = arith.constant 0.000000e+00 : f32
    %6 = vector.broadcast %cst_5 : f32 to vector<16x256xf32>
    %7 = arith.maximumf %5, %6 : vector<16x256xf32>
    %c0_6 = arith.constant 0 : index
    %c0_7 = arith.constant 0 : index
    %8 = vector.load %arg4[%c0_6, %c0_7] : memref<256x32xf32, #tpu.memory_space<vmem>>, vector<256x32xf32>
    %cst_8 = arith.constant dense<0.000000e+00> : vector<16x32xf32>
    %9 = tpu.matmul %7, %8, %cst_8 {dimension_numbers = #tpu.dot_dimension_numbers<[1], [0], [0], [1], [0, 0, 1, 1], [], []>, precision = #tpu.contract_precision<fp32>} : vector<16x256xf32>, vector<256x32xf32>, vector<16x32xf32> -> vector<16x32xf32>
    %c0_9 = arith.constant 0 : index
    %c0_10 = arith.constant 0 : index
    %10 = vector.load %arg5[%c0_9, %c0_10] : memref<1x32xf32, #tpu.memory_space<vmem>>, vector<1x32xf32>
    %11 = vector.broadcast %10 : vector<1x32xf32> to vector<16x32xf32>
    %12 = arith.addf %9, %11 : vector<16x32xf32>
    %13 = math.tanh %12 : vector<16x32xf32>
    %c0_11 = arith.constant 0 : index
    %c0_12 = arith.constant 0 : index
    %14 = vector.load %arg6[%c0_11, %c0_12] : memref<16x32xf32, #tpu.memory_space<vmem>>, vector<16x32xf32>
    tpu.vector_store %arg6[%c0_11, %c0_12], %13 {strides = array<i32>} : memref<16x32xf32, #tpu.memory_space<vmem>>, vector<16x32xf32>,
    return
  }
  func.func @transform_0(%arg0: i32) -> (i32, i32) {
    %c0_i32 = arith.constant 0 : i32
    %c0_i32_0 = arith.constant 0 : i32
    return %arg0, %c0_i32 : i32, i32
  }
  func.func @transform_1(%arg0: i32) -> (i32, i32) {
    %c0_i32 = arith.constant 0 : i32
    %c0_i32_0 = arith.constant 0 : i32
    %c0_i32_1 = arith.constant 0 : i32
    return %c0_i32, %c0_i32_0 : i32, i32
  }
  func.func @transform_2(%arg0: i32) -> (i32, i32) {
    %c0_i32 = arith.constant 0 : i32
    %c0_i32_0 = arith.constant 0 : i32
    %c0_i32_1 = arith.constant 0 : i32
    return %c0_i32, %c0_i32_0 : i32, i32
  }
  func.func @transform_3(%arg0: i32) -> (i32, i32) {
    %c0_i32 = arith.constant 0 : i32
    %c0_i32_0 = arith.constant 0 : i32
    %c0_i32_1 = arith.constant 0 : i32
    return %c0_i32, %c0_i32_0 : i32, i32
  }
  func.func @transform_4(%arg0: i32) -> (i32, i32) {
    %c0_i32 = arith.constant 0 : i32
    %c0_i32_0 = arith.constant 0 : i32
    %c0_i32_1 = arith.constant 0 : i32
    return %c0_i32, %c0_i32_0 : i32, i32
  }
  func.func @transform_5(%arg0: i32) -> (i32, i32) {
    %c0_i32 = arith.constant 0 : i32
    %c0_i32_0 = arith.constant 0 : i32
    return %arg0, %c0_i32 : i32, i32
  }
}

</mosaic_0001>

<bundles_post_ra>
// kernel: tpu_custom_call.1
= control target key start
LH: loop header
LB: loop body
LE: loop exit
PB: predicated region body
PF: predicated region fallthrough
CT: control target
= control target key end

     0   :  { %10 = vsyncpa [#allocation3], 0  ;;  %s5555_s0 = inlined_call_operand.vmem [shape: f32[20,204], index: 0, kind: input, shape index: {}]   ;;  %s5556_s1 = inlined_call_operand.hbm [shape: f32[204,256], index: 1, kind: input, shape index: {}]   ;;  %s5557_s2 = inlined_call_operand.vmem [shape: f32[1,256], index: 2, kind: input, shape index: {}]   ;;  %s5558_s3 = inlined_call_operand.vmem [shape: f32[256,32], index: 3, kind: input, shape index: {}]   ;;  %s5559_s4 = inlined_call_operand.vmem [shape: f32[1,32], index: 4, kind: input, shape index: {}]   ;;  %s5560_s5 = inlined_call_operand.hbm [shape: f32[20,32], index: 5, kind: output, shape index: {}]  }
   0x1   :  { %11 = vsyncpa [#allocation4], 0 }
   0x2   :  { %13 = vsyncpa [#allocation4 + $0x1], 0  ;;  %s3572_s18 = smov 0   ;;  %s3574_s19 = smov 0  }
   0x3   :  { %s3576_s20 = smov 0   ;;  %s3578_s21 = smov 0  }
   0x4 LB: > { %s3593_s22 = sadd.s32 4294967295, %s3534_s21   ;;  %s2605_s23 = sadd.s32 4294967294, %s3534_s21   ;;  %s3534_s21 = sphi %s3578_s21, %s6283_s21   ;;  %s3530_s20 = sphi %s3576_s20, %s6282_s20   ;;  %s3526_s19 = sphi %s3574_s19, %s6281_s19   ;;  %s3522_s18 = sphi %s3572_s18, %s6280_s18  }
   0x5   : > { %s3597_s24 = sadd.s32 1, %s3534_s21   ;;  %s136_s25 = sadd.s32 1, %s3530_s20 }
   0x6   : > { %s133_s26 = ssub.s32 %s3534_s21, %s3597_s24  ;;  %p146_p0 = scmp.ne.s32.totalorder %s3530_s20, %s3526_s19 }
   0x7   : > { %p134_p1 = scmp.eq.s32.totalorder %s133_s26, 0  ;;  %p147_p2 = scmp.eq.s32.totalorder %s3593_s22, 1 }
   0x8   : > { %p152_p3 = scmp.ne.s32.totalorder %s3526_s19, %s3522_s18  ;;  %p153_p4 = scmp.eq.s32.totalorder %s2605_s23, 1 }
   0x9   : > { %s3608_s27 = scalar_select %p134_p1, %s3530_s20, %s136_s25  }
   0xa   : > { %p3610_p5 = por %p147_p2, %p146_p0  ;;  %p3614_p6 = por %p153_p4, %p152_p3 }
   0xb   : > { %p2606_p7 = scmp.ge.s32.totalorder %s3534_s21, 1  ;;  %p160_p8 = scmp.lt.s32.totalorder %s3534_s21, 3 }
   0xc   : > { %s5831_s28 = scalar_select %p3610_p5, 1, 0 }
   0xd   : > { %s5832_s29 = scalar_select %p3614_p6, 1, 0 }
   0xe   : > { %p5561_p9 = scmp.eq.s32.totalorder %s3593_s22, 0  ;;  %p3621_p10 = pnand %p2606_p7, %p160_p8 }
   0xf   : > { %s3536_s6 = smov [#allocation2]   ;;  %s3440_s11 = scalar_lea.hbm %s5556_s1, 6656 }
  0x10   : > { %s5833_s30 = scalar_select %p3621_p10, 1, 0 }
  0x11   : > { %s172_s7 = sshll.u32 %s3536_s6, 4  ;;  %p3388_p11 = pneg %p3621_p10  ;;  %s173_s7 = int_to_ptr.vmem [resolvable:$true] %s172_s7 }
  0x12   : > { %p3441_p13 = scmp.ne.s32.totalorder %s5556_s1, %s3440_s11  ;;  %p3447_p3 = scmp.lt.u32.totalorder %s3440_s11, %s5556_s1 }
  0x13   : > { %p3629_p12 = pnand %p5561_p9, %p3388_p11 }
  0x15   : > { %p3442_p0 = pneg %p3629_p12 }
  0x17   : > { %p3443_p1 = pnand %p3442_p0, %p3441_p13 }
  0x19   : > { %p3444_p2 = pneg %p3443_p1 }
  0x1b   : > { %p3449_p4 = pnand %p3447_p3, %p3444_p2 }
  0x1d   : > { %3452 = shalt.err (!%p3449_p4)
}
  0x1e   : > { %s3453_s16 = scalar_lea.vmem %s173_s7, 6656  ;;  %p3461_p9 = scmp.lt.s32.totalorder %s173_s7, %s173_s7 }
  0x1f   : > { %p3454_p7 = scmp.ne.s32.totalorder %s173_s7, %s3453_s16  ;;  %p3462_p6 = scmp.lt.s32.totalorder %s3453_s16, %s3453_s16 }
  0x21   : > { %p3456_p8 = pnand %p3454_p7, %p3442_p0  ;;  %p3463_p5 = por %p3462_p6, %p3461_p9 }
  0x23   : > { %p3457_p11 = pneg %p3456_p8 }
  0x25   : > { %p3464_p10 = pnand %p3463_p5, %p3457_p11 }
  0x27   : > { %3467 = shalt.err (!%p3464_p10)
}
  0x28   : > { %s3537_s17 = smov 256   ;;  %s3538_s23 = smov 16  }
  0x29   : > { %3391 = dma.hbm_to_vmem [thread:$0]  (!%p3629_p12), %s5556_s1, 6656, %s173_s7, [#allocation3], %s3537_s17, %s3537_s17, %s3538_s23  }
  0x2a   : > { %p5835_p13 = scmp.ne.s32.totalorder %s5833_s30, 0 }
  0x2c   : > { %217 = sbr.rel (%p5835_p13) target bundleno = 1011 (0x3f3), region = 40 }
  0x33   : > { %p5836_p1 = scmp.eq.s32.totalorder %s3593_s22, 0 }
  0x35   : > { %3513 = dma.done.wait (%p5836_p1), [#allocation3], 6656   ;;  %p5837_p0 = pmov %p5836_p1 }
  0x36   : > { %v3655_v0 = vld [vmem:[#allocation2 + $0x8] sm:$0xff]  ;;  %v3657_v1 = vld [vmem:[#allocation2 + $0x18] sm:$0xff]  ;;  %v3659_v2 = vld [vmem:[#allocation2] sm:$0xff]  ;;  %s4093_s30 = sshll.u32 %s3593_s22, 1  ;;  %vm348_vm0 = vcmask 1043456   ;;  %vm341_vm1 = vcmask 621568  }
  0x37   : > { %3515 = vsyncadd (%p5837_p0), [#allocation3], 4294960640  ;;  %5838 = vst [vmem:[#allocation8_spill] sm:$0xff] %v3659_v2  ;;  %v5605_v3 = vand.u32 4294901760, %v3655_v0  ;;  %v5603_v4 = vand.u32 4294901760, %v3657_v1  ;;  %v3663_v5 = vld [vmem:[#allocation2 + $0x10] sm:$0xff] }
  0x38   : > { %5839 = vst [vmem:[#allocation9_spill] sm:$0xff] %v3663_v5  ;;  %v5592_v6 = vand.u32 4294901760, %v3659_v2  ;;  %v3666_v7 = vld [vmem:[#allocation2 + $0x28] sm:$0xff]  ;;  %v3668_v8 = vld [vmem:[#allocation2 + $0x38] sm:$0xff]  ;;  %v5591_v9 = vand.u32 4294901760, %v3663_v5  ;;  %v3673_v12 = vld [vmem:[#allocation2 + $0x20] sm:$0xff] }
  0x39   : > { %5840 = vst [vmem:[#allocation10_spill] sm:$0xff] %v3666_v7  ;;  %5841 = vst [vmem:[#allocation11_spill] sm:$0xff] %v3668_v8  ;;  %v5590_v10 = vand.u32 4294901760, %v3666_v7  ;;  %v5589_v11 = vand.u32 4294901760, %v3668_v8  ;;  %v3675_v13 = vld [vmem:[#allocation2 + $0x30] sm:$0xff]  ;;  %v3680_v14 = vsub.f32 %v3655_v0, %v5605_v3  ;;  %v3685_v15 = vsub.f32 %v3657_v1, %v5603_v4  ;;  %v3745_v38 = vld [vmem:[#allocation2 + $0x48] sm:$0xff] }
  0x3a   : > { %5842 = vst [vmem:[#allocation12_spill] sm:$0xff] %v3673_v12  ;;  %5843 = vst [vmem:[#allocation13_spill] sm:$0xff] %v3675_v13  ;;  %v3690_v16 = vsub.f32 %v3659_v2, %v5592_v6  ;;  %v5588_v17 = vand.u32 4294901760, %v3673_v12  ;;  %v3696_v18 = vsub.f32 %v3663_v5, %v5591_v9  ;;  %v5587_v21 = vand.u32 4294901760, %v3675_v13  ;;  %v3747_v39 = vld [vmem:[#allocation2 + $0x58] sm:$0xff]  ;;  %v3752_v44 = vld [vmem:[#allocation2 + $0x40] sm:$0xff] }
  0x3b   : > { %5844 = vst [vmem:[#allocation14_spill] sm:$0xff] %v3680_v14  ;;  %5845 = vst [vmem:[#allocation15_spill] sm:$0xff] %v3685_v15  ;;  %v3701_v19 = vsub.f32 %v3666_v7, %v5590_v10  ;;  %v3706_v20 = vsub.f32 %v3668_v8, %v5589_v11  ;;  %v5573_v22 = vand.u32 4294901760, %v3680_v14  ;;  %v5572_v23 = vand.u32 4294901760, %v3685_v15  ;;  %v3757_v49 = vld [vmem:[#allocation2 + $0x50] sm:$0xff]  ;;  %v3759_v50 = vld [vmem:[#allocation2 + $0x68] sm:$0xff] }
  0x3c   : > { %5846 = vst [vmem:[#allocation16_spill] sm:$0xff] %v3690_v16  ;;  %5847 = vst [vmem:[#allocation17_spill] sm:$0xff] %v3696_v18  ;;  %v5571_v24 = vand.u32 4294901760, %v3690_v16  ;;  %v3715_v25 = vsub.f32 %v3673_v12, %v5588_v17  ;;  %v5570_v26 = vand.u32 4294901760, %v3696_v18  ;;  %v3723_v29 = vsub.f32 %v3675_v13, %v5587_v21  ;;  %v3763_v55 = vld [vmem:[#allocation2 + $0x78] sm:$0xff]  ;;  %v3765_v56 = vld [vmem:[#allocation2 + $0x60] sm:$0xff] }
  0x3d   : > { %5848 = vst [vmem:[#allocation18_spill] sm:$0xff] %v3701_v19  ;;  %5849 = vst [vmem:[#allocation19_spill] sm:$0xff] %v3706_v20  ;;  %v5568_v27 = vand.u32 4294901760, %v3701_v19  ;;  %v5566_v28 = vand.u32 4294901760, %v3706_v20  ;;  %v507_v30 = vsub.f32 %v3680_v14, %v5573_v22  ;;  %v519_v31 = vsub.f32 %v3685_v15, %v5572_v23  ;;  %v3848_v22 = vld [vmem:[#allocation2 + $0x80] sm:$0xff]  ;;  %p257_p5 = scmp.lt.s32.totalorder %s4093_s30, 2 }
  0x3e   : > { %5850 = vst [vmem:[#allocation20_spill] sm:$0xff] %v3715_v25  ;;  %5851 = vst [vmem:[#allocation21_spill] sm:$0xff] %v3723_v29  ;;  %v513_v32 = vsub.f32 %v3690_v16, %v5571_v24  ;;  %v5564_v33 = vand.u32 4294901760, %v3715_v25  ;;  %v525_v34 = vsub.f32 %v3696_v18, %v5570_v26  ;;  %v5563_v37 = vand.u32 4294901760, %v3723_v29  ;;  %v3839_v26 = vld [vmem:[#allocation2 + $0x98] sm:$0xff]  ;;  %v3941_v3 = vld [vmem:[#allocation2 + $0xc0] sm:$0xff] }
  0x3f   : > { %v531_v35 = vsub.f32 %v3701_v19, %v5568_v27  ;;  %v543_v36 = vsub.f32 %v3706_v20, %v5566_v28  ;;  %5852 = vst [vmem:[#allocation22_spill] sm:$0xff] %v3745_v38  ;;  %5853 = vst [vmem:[#allocation23_spill] sm:$0xff] %v3747_v39  ;;  %v508_v40 = vand.u32 4294901760, %v507_v30  ;;  %v520_v41 = vand.u32 4294901760, %v519_v31  ;;  %v3780_v31 = vld [vmem:[#allocation2 + $0x70] sm:$0xff]  ;;  %v3831_v28 = vld [vmem:[#allocation2 + $0x88] sm:$0xff] }
  0x40   : > { %v514_v42 = vand.u32 4294901760, %v513_v32  ;;  %v537_v43 = vsub.f32 %v3715_v25, %v5564_v33  ;;  %5854 = vst [vmem:[#allocation24_spill] sm:$0xff] %v3752_v44  ;;  %v526_v45 = vand.u32 4294901760, %v525_v34  ;;  %v549_v48 = vsub.f32 %v3723_v29, %v5563_v37  ;;  %5855 = vst [vmem:[#allocation25_spill] sm:$0xff] %v3757_v49  ;;  %s4157_s6 = scalar_select %p257_p5, %s4093_s30, 2 }
  0x41   : > { %v532_v46 = vand.u32 4294901760, %v531_v35  ;;  %v544_v47 = vand.u32 4294901760, %v543_v36  ;;  %5856 = vst [vmem:[#allocation26_spill] sm:$0xff] %v3759_v50  ;;  %v2907_v51 = vpack.c.bf16 %v520_v41, %v508_v40  ;;  %v5586_v53 = vand.u32 4294901760, %v3745_v38  ;;  %5857 = vst [vmem:[#allocation27_spill] sm:$0xff] %v3763_v55  ;;  %s248_s25 = sand.u32 1, %s3526_s19  }
  0x42   : > { %v538_v52 = vand.u32 4294901760, %v537_v43  ;;  %v5584_v54 = vand.u32 4294901760, %v3747_v39  ;;  %5858 = vst [vmem:[#allocation28_spill] sm:$0xff] %v3765_v56  ;;  %v2909_v57 = vpack.c.bf16 %v526_v45, %v514_v42  ;;  %v550_v59 = vand.u32 4294901760, %v549_v48  ;;  %5861 = vst [vmem:[#allocation31_spill] sm:$0xff] %v3780_v31  ;;  %s2625_s7 = sshll.u32 %s4157_s6, 4 }
  0x43   : > { %v2911_v58 = vpack.c.bf16 %v544_v47, %v532_v46  ;;  %v5583_v60 = vand.u32 4294901760, %v3752_v44  ;;  %2908 = vmatprep.subr.bf16.mxu0 %v2907_v51  ;;  %v3771_v61 = vsub.f32 %v3745_v38, %v5586_v53  ;;  %v5580_v63 = vand.u32 4294901760, %v3757_v49  ;;  %5866 = vst [vmem:[#allocation36_spill] sm:$0xff] %v3831_v28  ;;  %5867 = vst [vmem:[#allocation37_spill] sm:$0xff] %v3839_v26  ;;  %s4226_s10 = scalar_lea.vmem %s5555_s0, %s2625_s7  ;;  %s2611_s26 = sshll.u32 %s248_s25, 4 }
  0x44   : > { %v3776_v62 = vsub.f32 %v3747_v39, %v5584_v54  ;;  %v5579_v30 = vand.u32 4294901760, %v3759_v50  ;;  %2910 = vmatpush1.bf16.msra.mxu0 %v2909_v57  ;;  %v2913_v32 = vpack.c.bf16 %v550_v59, %v538_v52  ;;  %v5578_v35 = vand.u32 4294901760, %v3763_v55  ;;  %5868 = vst [vmem:[#allocation38_spill] sm:$0xff] %v3848_v22  ;;  %5876 = vst [vmem:[#allocation46_spill] sm:$0xff] %v3941_v3  ;;  %s250_s6 = scalar_lea.vmem [#allocation5], %s2611_s26  ;;  %s5495_s7 = scalar_lea.sflag [#allocation4], %s248_s25 }
  0x45   : > { %5859 = vst [vmem:[#allocation29_spill] sm:$0xff] %v3771_v61  ;;  %v3785_v34 = vsub.f32 %v3752_v44, %v5583_v60  ;;  %v5576_v36 = vand.u32 4294901760, %v3765_v56  ;;  %2912 = vmatprep.subr.bf16.mxu0 %v2911_v58  ;;  %v5565_v40 = vand.u32 4294901760, %v3771_v61  ;;  %v3794_v42 = vsub.f32 %v3757_v49, %v5580_v63  ;;  %v3859_v60 = vld [vmem:[#allocation2 + $0xb8] sm:$0xff]  ;;  %p6278_p6 = scmp.ne.s32.totalorder %s5831_s28, 0 }
  0x46   : > { %5860 = vst [vmem:[#allocation30_spill] sm:$0xff] %v3776_v62  ;;  %v5567_v41 = vand.u32 4294901760, %v3776_v62  ;;  %v3799_v43 = vsub.f32 %v3759_v50, %v5579_v30  ;;  %v3805_v46 = vsub.f32 %v3763_v55, %v5578_v35  ;;  %v5575_v47 = vand.u32 4294901760, %v3780_v31  ;;  %5871 = vst [vmem:[#allocation41_spill] sm:$0xff] %v3859_v60  ;;  %v3957_v44 = vld [vmem:[#allocation2 + $0xf8] sm:$0xff]  ;;  %s2520_s8 = ssub.s32 (%p6278_p6), 3, %s4093_s30 }
  0x47   : > { %v5569_v45 = vand.u32 4294901760, %v3785_v34  ;;  %v3811_v48 = vsub.f32 %v3765_v56, %v5576_v36  ;;  %v555_v51 = vsub.f32 %v3771_v61, %v5565_v40  ;;  %v5574_v57 = vand.u32 4294901760, %v3794_v42  ;;  %5880 = vst [vmem:[#allocation49_spill] sm:$0xff] %v3957_v44  ;;  %p2521_p9 = scmp.lt.s32.totalorder (%p6278_p6), %s2520_s8, 2 }
  0x48   : > { %5862 = vst [vmem:[#allocation32_spill] sm:$0xff] %v3799_v43  ;;  %5863 = vst [vmem:[#allocation33_spill] sm:$0xff] %v3805_v46  ;;  %v567_v52 = vsub.f32 %v3776_v62, %v5567_v41  ;;  %v5577_v58 = vand.u32 4294901760, %v3799_v43  ;;  %2914 = vmatpush1.bf16.msra.mxu0 %v2913_v32  ;;  %v5581_v37 = vand.u32 4294901760, %v3805_v46  ;;  %v3829_v40 = vsub.f32 %v3780_v31, %v5575_v47 }
  0x49   : > { %5864 = vst [vmem:[#allocation34_spill] sm:$0xff] %v3811_v48  ;;  %v561_v59 = vsub.f32 %v3785_v34, %v5569_v45  ;;  %v5582_v33 = vand.u32 4294901760, %v3811_v48  ;;  %v556_v41 = vand.u32 4294901760, %v555_v51  ;;  %v573_v32 = vsub.f32 %v3794_v42, %v5574_v57  ;;  %v3850_v57 = vld [vmem:[#allocation2 + $0x90] sm:$0xff] }
  0x4a   : > { %5865 = vst [vmem:[#allocation35_spill] sm:$0xff] %v3829_v40  ;;  %v568_v27 = vand.u32 4294901760, %v567_v52  ;;  %v579_v45 = vsub.f32 %v3799_v43, %v5577_v58  ;;  %v591_v23 = vsub.f32 %v3805_v46, %v5581_v37  ;;  %v5585_v52 = vand.u32 4294901760, %v3829_v40  ;;  %5869 = vst [vmem:[#allocation39_spill] sm:$0xff] %v3850_v57 }
  0x4b   : > { %v562_v24 = vand.u32 4294901760, %v561_v59  ;;  %v585_v51 = vsub.f32 %v3811_v48, %v5582_v33  ;;  %v574_v36 = vand.u32 4294901760, %v573_v32  ;;  %v5601_v35 = vand.u32 4294901760, %v3831_v28  ;;  %v3853_v59 = vld [vmem:[#allocation2 + $0xa8] sm:$0xff] }
  0x4c   : > { %v2915_v47 = vpack.c.bf16 %v568_v27, %v556_v41  ;;  %v580_v58 = vand.u32 4294901760, %v579_v45  ;;  %5870 = vst [vmem:[#allocation40_spill] sm:$0xff] %v3853_v59  ;;  %v592_v30 = vand.u32 4294901760, %v591_v23  ;;  %v597_v37 = vsub.f32 %v3829_v40, %v5585_v52  ;;  %v3868_v45 = vld [vmem:[#allocation2 + $0xa0] sm:$0xff] }
  0x4d   : > { %v586_v63 = vand.u32 4294901760, %v585_v51  ;;  %v5599_v33 = vand.u32 4294901760, %v3839_v26  ;;  %v2917_v54 = vpack.c.bf16 %v574_v36, %v562_v24  ;;  %v3864_v27 = vsub.f32 %v3831_v28, %v5601_v35  ;;  %5872 = vst [vmem:[#allocation42_spill] sm:$0xff] %v3868_v45 }
  0x4e   : > { %2916 = vmatprep.subr.bf16.mxu0 %v2915_v47  ;;  %v5598_v41 = vand.u32 4294901760, %v3848_v22  ;;  %v5595_v23 = vand.u32 4294901760, %v3850_v57  ;;  %v2919_v32 = vpack.c.bf16 %v592_v30, %v580_v58  ;;  %v598_v51 = vand.u32 4294901760, %v597_v37  ;;  %v3888_v58 = vld [vmem:[#allocation2 + $0xb0] sm:$0xff] }
  0x4f   : > { %v3873_v52 = vsub.f32 %v3839_v26, %v5599_v33  ;;  %v5594_v24 = vand.u32 4294901760, %v3853_v59  ;;  %2918 = vmatpush1.bf16.msra.mxu0 %v2917_v54  ;;  %v5593_v36 = vand.u32 4294901760, %v3864_v27  ;;  %v5596_v37 = vand.u32 4294901760, %v3859_v60  ;;  %5873 = vst [vmem:[#allocation43_spill] sm:$0xff] %v3888_v58 }
  0x50   : > { %v3880_v47 = vsub.f32 %v3848_v22, %v5598_v41  ;;  %v3885_v30 = vsub.f32 %v3850_v57, %v5595_v23  ;;  %2920 = vmatprep.subr.bf16.mxu0 %v2919_v32  ;;  %v2921_v53 = vpack.c.bf16 %v598_v51, %v586_v63  ;;  %v5600_v17 = vand.u32 4294901760, %v3868_v45  ;;  %v4143_v57 = vld [vmem:[#allocation2 + $0x168] sm:$0xff] }
  0x51   : > { %v5597_v54 = vand.u32 4294901760, %v3873_v52  ;;  %v3894_v21 = vsub.f32 %v3853_v59, %v5594_v24  ;;  %v603_v11 = vsub.f32 %v3864_v27, %v5593_v36  ;;  %v3905_v63 = vsub.f32 %v3859_v60, %v5596_v37  ;;  %v3917_v24 = vld [vmem:[#allocation2 + $0xc8] sm:$0xff]  ;;  %5905 = vst [vmem:[#allocation64_spill] sm:$0xff] %v4143_v57 }
  0x52   : > { %v5602_v10 = vand.u32 4294901760, %v3880_v47  ;;  %v5604_v9 = vand.u32 4294901760, %v3885_v30  ;;  %v5609_v6 = vand.u32 4294901760, %v3888_v58  ;;  %v3915_v36 = vsub.f32 %v3868_v45, %v5600_v17  ;;  %5874 = vst [vmem:[#allocation44_spill] sm:$0xff] %v3917_v24 }
  0x53   : > { %v615_v32 = vsub.f32 %v3873_v52, %v5597_v54  ;;  %v5606_v51 = vand.u32 4294901760, %v3894_v21  ;;  %2922 = vmatpush1.bf16.msra.mxu0 %v2921_v53  ;;  %v604_v23 = vand.u32 4294901760, %v603_v11  ;;  %v5612_v41 = vand.u32 4294901760, %v3905_v63  ;;  %v3935_v53 = vld [vmem:[#allocation2 + $0xd8] sm:$0xff] }
  0x54   : > { %v609_v37 = vsub.f32 %v3880_v47, %v5602_v10  ;;  %v621_v54 = vsub.f32 %v3885_v30, %v5604_v9  ;;  %v3933_v11 = vsub.f32 %v3888_v58, %v5609_v6  ;;  %5875 = vst [vmem:[#allocation45_spill] sm:$0xff] %v3935_v53  ;;  %v5878_v56 = vand.u32 4294901760, %v3915_v36  ;;  %v4120_v58 = vld [vmem:[#allocation2 + $0x158] sm:$0xff] }
  0x55   : > { %v616_v33 = vand.u32 4294901760, %v615_v32  ;;  %v627_v17 = vsub.f32 %v3894_v21, %v5606_v51  ;;  %v639_v9 = vsub.f32 %v3905_v63, %v5612_v41  ;;  %v5615_v32 = vand.u32 4294901760, %v3917_v24  ;;  %v3943_v51 = vld [vmem:[#allocation2 + $0xd0] sm:$0xff]  ;;  %5900 = vst [vmem:[#allocation61_spill] sm:$0xff] %v4120_v58 }
  0x56   : > { %v610_v10 = vand.u32 4294901760, %v609_v37  ;;  %v622_v4 = vand.u32 4294901760, %v621_v54  ;;  %5877 = vst [vmem:[#allocation47_spill] sm:$0xff] %v3943_v51  ;;  %v633_v6 = vsub.f32 %v3915_v36, %v5878_v56  ;;  %v5616_v55 = vand.u32 4294901760, %v3933_v11  ;;  %v3949_v37 = vld [vmem:[#allocation2 + $0xe8] sm:$0xff] }
  0x57   : > { %v2923_v35 = vpack.c.bf16 %v616_v33, %v604_v23  ;;  %v628_v31 = vand.u32 4294901760, %v627_v17  ;;  %5879 = vst [vmem:[#allocation48_spill] sm:$0xff] %v3949_v37  ;;  %v640_v50 = vand.u32 4294901760, %v639_v9  ;;  %v5617_v41 = vand.u32 4294901760, %v3935_v53  ;;  %v3964_v9 = vld [vmem:[#allocation2 + $0xe0] sm:$0xff] }
  0x58   : > { %v2925_v54 = vpack.c.bf16 %v622_v4, %v610_v10  ;;  %v3955_v49 = vsub.f32 %v3917_v24, %v5615_v32  ;;  %v634_v17 = vand.u32 4294901760, %v633_v6  ;;  %v645_v33 = vsub.f32 %v3933_v11, %v5616_v55  ;;  %5881 = vst [vmem:[#allocation50_spill] sm:$0xff] %v3964_v9 }
  0x59   : > { %2924 = vmatprep.subr.bf16.mxu0 %v2923_v35  ;;  %v5618_v56 = vand.u32 4294901760, %v3941_v3  ;;  %v5620_v4 = vand.u32 4294901760, %v3943_v51  ;;  %v2927_v10 = vpack.c.bf16 %v640_v50, %v628_v31  ;;  %v3970_v32 = vsub.f32 %v3935_v53, %v5617_v41  ;;  %v3984_v31 = vld [vmem:[#allocation2 + $0xf0] sm:$0xff] }
  0x5a   : > { %2926 = vmatpush1.bf16.msra.mxu0 %v2925_v54  ;;  %v5623_v23 = vand.u32 4294901760, %v3955_v49  ;;  %v5625_v6 = vand.u32 4294901760, %v3949_v37  ;;  %v646_v35 = vand.u32 4294901760, %v645_v33  ;;  %5882 = vst [vmem:[#allocation51_spill] sm:$0xff] %v3984_v31  ;;  %vm2508_vm2 = vcmask 261120  }
  0x5b   : > { %v3976_v55 = vsub.f32 %v3941_v3, %v5618_v56  ;;  %v3981_v54 = vsub.f32 %v3943_v51, %v5620_v4  ;;  %2928 = vmatprep.subr.bf16.mxu0 %v2927_v10  ;;  %v5883_v10 = vand.u32 4294901760, %v3957_v44  ;;  %v5885_v12 = vand.u32 4294901760, %v3970_v32 }
  0x5c   : > { %v651_v41 = vsub.f32 %v3955_v49, %v5623_v23  ;;  %v3993_v56 = vsub.f32 %v3949_v37, %v5625_v6  ;;  %v2929_v4 = vpack.c.bf16 %v646_v35, %v634_v17  ;;  %v4003_v23 = vld [vmem:[#allocation2 + $0x108] sm:$0xff]  ;;  %v4039_v37 = vld [vmem:[#allocation2 + $0x110] sm:$0xff] }
  0x5d   : > { %v5628_v38 = vand.u32 4294901760, %v3976_v55  ;;  %v5630_v50 = vand.u32 4294901760, %v3981_v54  ;;  %v4001_v13 = vsub.f32 %v3957_v44, %v5883_v10  ;;  %5884 = vst [vmem:[#allocation52_spill] sm:$0xff] %v4003_v23  ;;  %v663_v6 = vsub.f32 %v3970_v32, %v5885_v12  ;;  %v4022_v12 = vld [vmem:[#allocation2 + $0x118] sm:$0xff]  ;;  %5892 = vst [vmem:[#allocation55_spill] sm:$0xff] %v4039_v37 }
  0x5e   : > { %v652_v33 = vand.u32 4294901760, %v651_v41  ;;  %2930 = vmatpush1.bf16.msra.mxu0 %v2929_v4  ;;  %v5886_v41 = vand.u32 4294901760, %v3964_v9  ;;  %5887 = vst [vmem:[#allocation53_spill] sm:$0xff] %v4022_v12  ;;  %v5888_v4 = vand.u32 4294901760, %v3993_v56 }
  0x5f   : > { %v657_v35 = vsub.f32 %v3976_v55, %v5628_v38  ;;  %v669_v10 = vsub.f32 %v3981_v54, %v5630_v50  ;;  %v664_v8 = vand.u32 4294901760, %v663_v6  ;;  %v5889_v38 = vand.u32 4294901760, %v3984_v31  ;;  %v4037_v6 = vld [vmem:[#allocation2 + $0x100] sm:$0xff] }
  0x60   : > { %v4020_v7 = vsub.f32 %v3964_v9, %v5886_v41  ;;  %v675_v17 = vsub.f32 %v3993_v56, %v5888_v4  ;;  %v5640_v50 = vand.u32 4294901760, %v4003_v23  ;;  %v5890_v44 = vand.u32 4294901760, %v4001_v13  ;;  %5891 = vst [vmem:[#allocation54_spill] sm:$0xff] %v4037_v6 }
  0x61   : > { %v4030_v5 = vsub.f32 %v3984_v31, %v5889_v38  ;;  %v658_v39 = vand.u32 4294901760, %v657_v35  ;;  %v670_v2 = vand.u32 4294901760, %v669_v10  ;;  %v2931_v4 = vpack.c.bf16 %v664_v8, %v652_v33  ;;  %v4043_v31 = vld [vmem:[#allocation2 + $0x128] sm:$0xff] }
  0x62   : > { %v687_v41 = vsub.f32 %v4001_v13, %v5890_v44  ;;  %v5639_v9 = vand.u32 4294901760, %v4020_v7  ;;  %v676_v51 = vand.u32 4294901760, %v675_v17  ;;  %v5643_v38 = vand.u32 4294901760, %v4022_v12  ;;  %5893 = vst [vmem:[#allocation56_spill] sm:$0xff] %v4043_v31  ;;  %v4063_v17 = vld [vmem:[#allocation2 + $0x138] sm:$0xff] }
  0x63   : > { %v5641_v3 = vand.u32 4294901760, %v4030_v5  ;;  %v2933_v35 = vpack.c.bf16 %v670_v2, %v658_v39  ;;  %v4051_v53 = vsub.f32 %v4003_v23, %v5640_v50  ;;  %2932 = vmatprep.subr.bf16.mxu0 %v2931_v4  ;;  %v5647_v2 = vand.u32 4294901760, %v4037_v6  ;;  %5894 = vst [vmem:[#allocation57_spill] sm:$0xff] %v4063_v17 }
  0x64   : > { %v688_v10 = vand.u32 4294901760, %v687_v41  ;;  %v681_v44 = vsub.f32 %v4020_v7, %v5639_v9  ;;  %v4059_v33 = vsub.f32 %v4022_v12, %v5643_v38  ;;  %v5646_v39 = vand.u32 4294901760, %v4039_v37  ;;  %v4065_v41 = vld [vmem:[#allocation2 + $0x120] sm:$0xff] }
  0x65   : > { %v693_v8 = vsub.f32 %v4030_v5, %v5641_v3  ;;  %5895 = vst [vmem:[#allocation58_spill] sm:$0xff] %v4065_v41  ;;  %2934 = vmatpush1.bf16.msra.mxu0 %v2933_v35  ;;  %v5648_v50 = vand.u32 4294901760, %v4051_v53  ;;  %v5650_v3 = vand.u32 4294901760, %v4043_v31  ;;  %v4073_v12 = vsub.f32 %v4037_v6, %v5647_v2  ;;  %v4080_v35 = vld [vmem:[#allocation2 + $0x130] sm:$0xff] }
  0x66   : > { %v2935_v4 = vpack.c.bf16 %v688_v10, %v676_v51  ;;  %v682_v9 = vand.u32 4294901760, %v681_v44  ;;  %v5652_v38 = vand.u32 4294901760, %v4059_v33  ;;  %v4078_v24 = vsub.f32 %v4039_v37, %v5646_v39  ;;  %5896 = vst [vmem:[#allocation59_spill] sm:$0xff] %v4080_v35  ;;  %v4100_v10 = vld [vmem:[#allocation2 + $0x148] sm:$0xff] }
  0x67   : > { %v694_v23 = vand.u32 4294901760, %v693_v8  ;;  %v699_v51 = vsub.f32 %v4051_v53, %v5648_v50  ;;  %v4089_v44 = vsub.f32 %v4043_v31, %v5650_v3  ;;  %v5655_v2 = vand.u32 4294901760, %v4073_v12  ;;  %5897 = vst [vmem:[#allocation60_spill] sm:$0xff] %v4100_v10 }
  0x68   : > { %2936 = vmatprep.subr.bf16.mxu0 %v2935_v4  ;;  %v711_v4 = vsub.f32 %v4059_v33, %v5652_v38  ;;  %v5656_v50 = vand.u32 4294901760, %v4078_v24  ;;  %v5898_v31 = vand.u32 4294901760, %v4063_v17 }
  0x69   : > { %v2937_v39 = vpack.c.bf16 %v694_v23, %v682_v9  ;;  %v700_v37 = vand.u32 4294901760, %v699_v51  ;;  %v5662_v9 = vand.u32 4294901760, %v4080_v35  ;;  %v705_v38 = vsub.f32 %v4073_v12, %v5655_v2 }
  0x6a   : > { %v4106_v8 = vsub.f32 %v4063_v17, %v5898_v31  ;;  %v712_v23 = vand.u32 4294901760, %v711_v4  ;;  %v717_v6 = vsub.f32 %v4078_v24, %v5656_v50  ;;  %v5899_v51 = vand.u32 4294901760, %v4065_v41  ;;  %v4133_v17 = vld [vmem:[#allocation2 + $0x140] sm:$0xff] }
  0x6b   : > { %2938 = vmatpush1.bf16.msra.mxu0 %v2937_v39  ;;  %v5901_v31 = vand.u32 4294901760, %v4089_v44  ;;  %v4130_v2 = vsub.f32 %v4080_v35, %v5662_v9  ;;  %5902 = vst [vmem:[#allocation62_spill] sm:$0xff] %v4133_v17  ;;  %v5669_v50 = vand.u32 4294901760, %v4120_v58 }
  0x6c   : > { %v4118_v3 = vsub.f32 %v4065_v41, %v5899_v51  ;;  %v2939_v51 = vpack.c.bf16 %v712_v23, %v700_v37  ;;  %v706_v41 = vand.u32 4294901760, %v705_v38  ;;  %v718_v45 = vand.u32 4294901760, %v717_v6 }
  0x6d   : > { %v723_v39 = vsub.f32 %v4089_v44, %v5901_v31  ;;  %v4136_v31 = vld [vmem:[#allocation2 + $0x150] sm:$0xff]  ;;  %v5904_v59 = vand.u32 4294901760, %v4106_v8  ;;  %v5667_v35 = vand.u32 4294901760, %v4130_v2  ;;  %v5906_v6 = vand.u32 4294901760, %v4100_v10 }
  0x6e   : > { %v5666_v60 = vand.u32 4294901760, %v4118_v3  ;;  %5903 = vst [vmem:[#allocation63_spill] sm:$0xff] %v4136_v31  ;;  %2940 = vmatprep.subr.bf16.mxu0 %v2939_v51  ;;  %v2941_v22 = vpack.c.bf16 %v718_v45, %v706_v41  ;;  %v5672_v23 = vand.u32 4294901760, %v4133_v17  ;;  %v4165_v45 = vsub.f32 %v4120_v58, %v5669_v50  ;;  %v4168_v51 = vld [vmem:[#allocation2 + $0x178] sm:$0xff] }
  0x6f   : > { %v724_v4 = vand.u32 4294901760, %v723_v39  ;;  %v735_v9 = vsub.f32 %v4106_v8, %v5904_v59  ;;  %v4151_v38 = vsub.f32 %v4100_v10, %v5906_v6  ;;  %v741_v39 = vsub.f32 %v4130_v2, %v5667_v35  ;;  %5909 = vst [vmem:[#allocation67_spill] sm:$0xff] %v4168_v51  ;;  %v4177_v10 = vld [vmem:[#allocation2 + $0x160] sm:$0xff] }
  0x70   : > { %v729_v37 = vsub.f32 %v4118_v3, %v5666_v60  ;;  %5908 = vst [vmem:[#allocation66_spill] sm:$0xff] %v4165_v45  ;;  %2942 = vmatpush1.bf16.msra.mxu0 %v2941_v22  ;;  %5911 = vst [vmem:[#allocation69_spill] sm:$0xff] %v4177_v10  ;;  %v5680_v41 = vand.u32 4294901760, %v4165_v45  ;;  %v5912_v22 = vand.u32 4294901760, %v4136_v31  ;;  %v5918_v28 = vand.u32 4294901760, %v4168_v51 }
  0x71   : > { %5907 = vst [vmem:[#allocation65_spill] sm:$0xff] %v4151_v38  ;;  %v736_v59 = vand.u32 4294901760, %v735_v9  ;;  %v5674_v60 = vand.u32 4294901760, %v4151_v38  ;;  %v4174_v9 = vsub.f32 %v4133_v17, %v5672_v23  ;;  %v742_v58 = vand.u32 4294901760, %v741_v39 }
  0x72   : > { %v730_v6 = vand.u32 4294901760, %v729_v37  ;;  %v4183_v37 = vsub.f32 %v4136_v31, %v5912_v22  ;;  %v5914_v17 = vand.u32 4294901760, %v4143_v57  ;;  %v759_v22 = vsub.f32 %v4165_v45, %v5680_v41 }
  0x73   : > { %5910 = vst [vmem:[#allocation68_spill] sm:$0xff] %v4174_v9  ;;  %v2943_v50 = vpack.c.bf16 %v736_v59, %v724_v4  ;;  %v747_v26 = vsub.f32 %v4151_v38, %v5674_v60  ;;  %v4195_v59 = vld [vmem:[#allocation2 + $0x170] sm:$0xff]  ;;  %v5682_v23 = vand.u32 4294901760, %v4177_v10  ;;  %v328_v38 = vld [vmem:[#allocation2 + $0x198] sm:$0xf]  ;;  %v5917_v31 = vand.u32 4294901760, %v4174_v9 }
  0x74   : > { %5913 = vst [vmem:[#allocation70_spill] sm:$0xff] %v4183_v37  ;;  %v4193_v4 = vsub.f32 %v4143_v57, %v5914_v17  ;;  %5916 = vst [vmem:[#allocation72_spill] sm:$0xff] %v4195_v59  ;;  %v2945_v39 = vpack.c.bf16 %v742_v58, %v730_v6  ;;  %v5681_v60 = vand.u32 4294901760, %v4183_v37  ;;  %v4210_v58 = vsub.f32 %v4168_v51, %v5918_v28 }
  0x75   : > { %2944 = vmatprep.subr.bf16.mxu0 %v2943_v50  ;;  %v748_v35 = vand.u32 4294901760, %v747_v26  ;;  %v753_v17 = vsub.f32 %v4174_v9, %v5917_v31  ;;  %v760_v50 = vand.u32 4294901760, %v759_v22  ;;  %v4219_v26 = vsub.f32 %v4177_v10, %v5682_v23  ;;  %v4221_v31 = vld [vmem:[#allocation2 + $0x188] sm:$0xff]  ;;  %v327_v23 = vld [vmem:[#allocation2 + $0x190] sm:$0xf] }
  0x76   : > { %5915 = vst [vmem:[#allocation71_spill] sm:$0xff] %v4193_v4  ;;  %v5691_v57 = vand.u32 4294901760, %v4193_v4  ;;  %5919 = vst [vmem:[#allocation73_spill] sm:$0xff] %v4210_v58  ;;  %2946 = vmatpush1.bf16.msra.mxu0 %v2945_v39  ;;  %v765_v6 = vsub.f32 %v4183_v37, %v5681_v60  ;;  %v5695_v22 = vand.u32 4294901760, %v4210_v58  ;;  %v4233_v60 = vsel %vm348_vm0, %v328_v38, 0 }
  0x77   : > { %5920 = vst [vmem:[#allocation74_spill] sm:$0xff] %v4219_v26  ;;  %v754_v28 = vand.u32 4294901760, %v753_v17  ;;  %v2947_v41 = vpack.c.bf16 %v760_v50, %v748_v35  ;;  %v5696_v9 = vand.u32 4294901760, %v4219_v26  ;;  %v5921_v45 = vand.u32 4294901760, %v4195_v59  ;;  %v4241_v17 = vld [vmem:[#allocation2 + $0x180] sm:$0xff]  ;;  %v274_v35 = vld [vmem:[%s4226_s10 + $0x8] sm:$0xff] }
  0x78   : > { %v771_v39 = vsub.f32 %v4193_v4, %v5691_v57  ;;  %v766_v37 = vand.u32 4294901760, %v765_v6  ;;  %v783_v57 = vsub.f32 %v4210_v58, %v5695_v22  ;;  %v5699_v38 = vand.u32 4294901760, %v4221_v31 }
  0x79   : > { %v4239_v10 = vsub.f32 %v4195_v59, %v5921_v45  ;;  %v5702_v4 = vand.u32 4294901760, %v4233_v60  ;;  %2948 = vmatprep.subr.bf16.mxu0 %v2947_v41  ;;  %v777_v6 = vsub.f32 %v4219_v26, %v5696_v9  ;;  %v4254_v59 = vsel %vm348_vm0, %v327_v23, 0 }
  0x7a   : > { %v772_v51 = vand.u32 4294901760, %v771_v39  ;;  %v2949_v50 = vpack.c.bf16 %v766_v37, %v754_v28  ;;  %v784_v39 = vand.u32 4294901760, %v783_v57  ;;  %v4259_v22 = vsub.f32 %v4221_v31, %v5699_v38 }
  0x7b   : > { %5922 = vst [vmem:[#allocation75_spill] sm:$0xff] %v4239_v10  ;;  %v5703_v45 = vand.u32 4294901760, %v4239_v10  ;;  %v4264_v41 = vsub.f32 %v4233_v60, %v5702_v4  ;;  %v5704_v37 = vand.u32 4294901760, %v4241_v17  ;;  %v778_v28 = vand.u32 4294901760, %v777_v6 }
  0x7c   : > { %2950 = vmatpush1.bf16.msra.mxu0 %v2949_v50  ;;  %v5705_v57 = vand.u32 4294901760, %v4254_v59  ;;  %v343_v9 = vsel %vm341_vm1, %v274_v35, 0  ;;  %v2951_v26 = vpack.c.bf16 %v784_v39, %v772_v51  ;;  %v5708_v38 = vand.u32 4294901760, %v4259_v22 }
  0x7d   : > { %v789_v23 = vsub.f32 %v4239_v10, %v5703_v45  ;;  %v5709_v58 = vand.u32 4294901760, %v4264_v41  ;;  %v4277_v4 = vsub.f32 %v4241_v17, %v5704_v37  ;;  %v4284_v45 = vand.u32 4294901760, %v343_v9 }
  0x7e   : > { %v4282_v6 = vsub.f32 %v4254_v59, %v5705_v57  ;;  %2952 = vmatprep.subr.bf16.mxu0 %v2951_v26  ;;  %v795_v51 = vsub.f32 %v4259_v22, %v5708_v38 }
  0x7f   : > { %5923 = vst [vmem:[#allocation76_spill] sm:$0xff] %v4277_v4  ;;  %v790_v50 = vand.u32 4294901760, %v789_v23  ;;  %5924 = vst [vmem:[#allocation77_spill] sm:$0xff] %v4284_v45  ;;  %v807_v35 = vsub.f32 %v4264_v41, %v5709_v58  ;;  %v5710_v39 = vand.u32 4294901760, %v4277_v4  ;;  %829 = vmatprep.mubr.f32.mxu0 %v4284_v45  ;;  %v2959_v58 = vpack.c.bf16 %v3685_v15, %v3680_v14  ;;  %v276_v15 = vld [vmem:[%s4226_s10 + $0x18] sm:$0xff] }
  0x80   : > { %v5713_v23 = vand.u32 4294901760, %v4282_v6  ;;  %v796_v57 = vand.u32 4294901760, %v795_v51 }
  0x81   : > { %v2953_v37 = vpack.c.bf16 %v790_v50, %v778_v28  ;;  %v808_v10 = vand.u32 4294901760, %v807_v35  ;;  %v801_v26 = vsub.f32 %v4277_v4, %v5710_v39  ;;  %v2967_v28 = vpack.c.bf16 %v3776_v62, %v3771_v61  ;;  %v5934_v39 = vld [vmem:[#allocation36_spill] sm:$0xff] }
  0x82   : > { %v813_v38 = vsub.f32 %v4282_v6, %v5713_v23  ;;  %v4312_v23 = vld [vmem:[%s4226_s10] sm:$0xff]  ;;  %v5935_v61 = vand.u32 4294901760, %v5934_v39  ;;  %v5948_v39 = vld [vmem:[#allocation43_spill] sm:$0xff] }
  0x83   : > { %2954 = vmatpush1.bf16.msra.mxu0 %v2953_v37  ;;  %v2955_v51 = vpack.c.bf16 %v808_v10, %v796_v57  ;;  %v802_v35 = vand.u32 4294901760, %v801_v26  ;;  %5925 = vst [vmem:[#allocation78_spill] sm:$0xff] %v4312_v23  ;;  %v4336_v50 = vand.u32 4294901760, %v4312_v23  ;;  %v2963_v10 = vpack.c.bf16 %v3706_v20, %v3701_v19  ;;  %v5936_v20 = vld [vmem:[#allocation37_spill] sm:$0xff] }
  0x84   : > { %v814_v4 = vand.u32 4294901760, %v813_v38  ;;  %v5931_v38 = vand.u32 4294901760, %v3655_v0  ;;  %v5937_v19 = vand.u32 4294901760, %v5936_v20  ;;  %v5942_v0 = vld [vmem:[#allocation40_spill] sm:$0xff] }
  0x85   : > { %2956 = vmatprep.subr.bf16.mxu0 %v2955_v51  ;;  %5926 = vst [vmem:[#allocation79_spill] sm:$0xff] %v4336_v50  ;;  %v4348_v51 = vld [vmem:[%s4226_s10 + $0x10] sm:$0xff]  ;;  %v5943_v14 = vand.u32 4294901760, %v5942_v0  ;;  %v5958_v0 = vld [vmem:[#allocation47_spill] sm:$0xff] }
  0x86   : > { %v2957_v37 = vpack.c.bf16 %v814_v4, %v802_v35  ;;  %v2961_v4 = vpack.c.bf16 %v3696_v18, %v3690_v16  ;;  %v4345_v35 = vsel %vm341_vm1, %v276_v15, 0  ;;  %5928 = vst [vmem:[#allocation81_spill] sm:$0xff] %v4348_v51  ;;  %v4359_v26 = vand.u32 4294901760, %v4348_v51  ;;  %v5940_v16 = vld [vmem:[#allocation39_spill] sm:$0xff] }
  0x87   : > { %5927 = vst [vmem:[#allocation80_spill] sm:$0xff] %v4345_v35  ;;  %v4353_v62 = vand.u32 4294901760, %v4345_v35  ;;  %v4362_v15 = vsub.f32 %v343_v9, %v4284_v45  ;;  %v5941_v9 = vand.u32 4294901760, %v5940_v16  ;;  %v5949_v35 = vand.u32 4294901760, %v5948_v39  ;;  %v5968_v39 = vld [vmem:[#allocation51_spill] sm:$0xff] }
  0x88   : > { %2958 = vmatpush1.bf16.msra.mxu0 %v2957_v37  ;;  %v2965_v37 = vpack.c.bf16 %v3723_v29, %v3715_v25  ;;  %5930 = vst [vmem:[#allocation83_spill] sm:$0xff] %v4359_v26  ;;  %v4375_v29 = vpack.c.bf16 %v5937_v19, %v5935_v61  ;;  %v5938_v25 = vld [vmem:[#allocation38_spill] sm:$0xff]  ;;  %v5951_v19 = vld [vmem:[#allocation44_spill] sm:$0xff]  ;;  %v5959_v23 = vand.u32 4294901760, %v5958_v0  ;;  %v5976_v0 = vld [vmem:[#allocation55_spill] sm:$0xff] }
  0x89   : > { %2960 = vmatprep.subr.bf16.mxu0 %v2959_v58  ;;  %5929 = vst [vmem:[#allocation82_spill] sm:$0xff] %v4353_v62  ;;  %v5932_v58 = vand.u32 4294901760, %v3657_v1  ;;  %v5939_v18 = vand.u32 4294901760, %v5938_v25  ;;  %v5944_v1 = vld [vmem:[#allocation41_spill] sm:$0xff]  ;;  %v5952_v61 = vand.u32 4294901760, %v5951_v19  ;;  %v5969_v19 = vand.u32 4294901760, %v5968_v39 }
  0x8a   : > { %v5953_v25 = vld [vmem:[#allocation45_spill] sm:$0xff] }
  0x8b   : > { %831 = vmatmul.mubr.f32.vlgmr.msra.gmra.mrb[0].mxu0 %v4336_v50  ;;  %v4368_v57 = vpack.c.bf16 %v5932_v58, %v5931_v38  ;;  %v4381_v45 = vpack.c.bf16 %v5941_v9, %v5939_v18  ;;  %v5945_v38 = vand.u32 4294901760, %v5944_v1  ;;  %v5956_v18 = vld [vmem:[#allocation46_spill] sm:$0xff] }
  0x8c   : > { %2962 = vmatpush1.bf16.msra.mxu0 %v2961_v4  ;;  %837 = vmatprep.mubr.f32.mxu0 %v4353_v62  ;;  %v5946_v4 = vld [vmem:[#allocation42_spill] sm:$0xff]  ;;  %v5954_v62 = vand.u32 4294901760, %v5953_v25  ;;  %v5957_v9 = vand.u32 4294901760, %v5956_v18  ;;  %v5972_v25 = vld [vmem:[#allocation53_spill] sm:$0xff] }
  0x8d   : > { %5933 = vst [vmem:[#allocation84_spill] sm:$0xff] %v4368_v57  ;;  %v4387_v58 = vpack.c.bf16 %v5945_v38, %v5943_v14  ;;  %2964 = vmatprep.subr.bf16.mxu0 %v2963_v10  ;;  %v5947_v51 = vand.u32 4294901760, %v5946_v4  ;;  %v5961_v14 = vld [vmem:[#allocation48_spill] sm:$0xff]  ;;  %v5963_v38 = vld [vmem:[#allocation49_spill] sm:$0xff]  ;;  %v5973_v18 = vand.u32 4294901760, %v5972_v25  ;;  %2856 = vmatprep.subr.bf16.mxu1 %v4368_v57 }
  0x8e   : > { %v4399_v16 = vpack.c.bf16 %v5954_v62, %v5952_v61  ;;  %v4405_v1 = vpack.c.bf16 %v5959_v23, %v5957_v9  ;;  %v5962_v10 = vand.u32 4294901760, %v5961_v14  ;;  %v5964_v4 = vand.u32 4294901760, %v5963_v38  ;;  %v5970_v62 = vld [vmem:[#allocation52_spill] sm:$0xff]  ;;  %v5974_v23 = vld [vmem:[#allocation54_spill] sm:$0xff] }
  0x8f   : > { %v4393_v20 = vpack.c.bf16 %v5949_v35, %v5947_v51  ;;  %v5966_v51 = vld [vmem:[#allocation50_spill] sm:$0xff]  ;;  %v5971_v61 = vand.u32 4294901760, %v5970_v62  ;;  %v5975_v9 = vand.u32 4294901760, %v5974_v23  ;;  %v5977_v14 = vand.u32 4294901760, %v5976_v0  ;;  %839 = vmatmul.mubr.f32.gmra.mrb[2].mxu0 %v4359_v26  ;;  %v5988_v25 = vld [vmem:[#allocation60_spill] sm:$0xff]  ;;  %v5990_v23 = vld [vmem:[#allocation61_spill] sm:$0xff] }
  0x90   : > { %5955 = vst [vmem:[#allocation37_spill] sm:$0xff] %v4399_v16  ;;  %5960 = vst [vmem:[#allocation38_spill] sm:$0xff] %v4405_v1  ;;  %v4411_v50 = vpack.c.bf16 %v5964_v4, %v5962_v10  ;;  %v5967_v35 = vand.u32 4294901760, %v5966_v51  ;;  %v5979_v10 = vld [vmem:[#allocation56_spill] sm:$0xff]  ;;  %v5981_v4 = vld [vmem:[#allocation57_spill] sm:$0xff]  ;;  %2966 = vmatpush1.bf16.msra.mxu0 %v2965_v37  ;;  %1015 = vmatprep.mubr.f32.mxu0 %v4362_v15 }
  0x91   : > { %5950 = vst [vmem:[#allocation36_spill] sm:$0xff] %v4393_v20  ;;  %v4423_v16 = vpack.c.bf16 %v5973_v18, %v5971_v61  ;;  %v4429_v1 = vpack.c.bf16 %v5977_v14, %v5975_v9  ;;  %v5980_v38 = vand.u32 4294901760, %v5979_v10  ;;  %v5982_v51 = vand.u32 4294901760, %v5981_v4  ;;  %v5992_v14 = vld [vmem:[#allocation62_spill] sm:$0xff]  ;;  %v5996_v57 = vld [vmem:[#allocation64_spill] sm:$0xff]  ;;  %2968 = vmatprep.subr.bf16.mxu0 %v2967_v28 }
  0x92   : > { %5965 = vst [vmem:[#allocation39_spill] sm:$0xff] %v4411_v50  ;;  %v4417_v20 = vpack.c.bf16 %v5969_v19, %v5967_v35  ;;  %v5984_v35 = vld [vmem:[#allocation58_spill] sm:$0xff]  ;;  %v5986_v19 = vld [vmem:[#allocation59_spill] sm:$0xff]  ;;  %v5989_v18 = vand.u32 4294901760, %v5988_v25  ;;  %v5991_v9 = vand.u32 4294901760, %v5990_v23  ;;  %v5993_v10 = vand.u32 4294901760, %v5992_v14 }
  0x93   : > { %5978 = vst [vmem:[#allocation40_spill] sm:$0xff] %v4429_v1  ;;  %v4435_v50 = vpack.c.bf16 %v5982_v51, %v5980_v38  ;;  %v5985_v39 = vand.u32 4294901760, %v5984_v35  ;;  %v5987_v62 = vand.u32 4294901760, %v5986_v19  ;;  %v5994_v38 = vld [vmem:[#allocation63_spill] sm:$0xff]  ;;  %v5997_v26 = vand.u32 4294901760, %v5996_v57  ;;  %v6004_v23 = vld [vmem:[#allocation69_spill] sm:$0xff] }
  0x94   : > { %v4449_v0 = vpack.c.bf16 %v5991_v9, %v5989_v18  ;;  %v5995_v4 = vand.u32 4294901760, %v5994_v38  ;;  %v6005_v9 = vand.u32 4294901760, %v6004_v23  ;;  %v6006_v14 = vld [vmem:[#allocation72_spill] sm:$0xff]  ;;  %v6008_v57 = vand.u32 4294901760, %v4221_v31  ;;  %v6010_v37 = vld [vmem:[#allocation10_spill] sm:$0xff] }
  0x95   : > { %5983 = vst [vmem:[#allocation41_spill] sm:$0xff] %v4435_v50  ;;  %v4443_v61 = vpack.c.bf16 %v5987_v62, %v5985_v39  ;;  %v5998_v50 = vld [vmem:[#allocation67_spill] sm:$0xff]  ;;  %v6000_v39 = vld [vmem:[#allocation8_spill] sm:$0xff]  ;;  %v6002_v62 = vld [vmem:[#allocation9_spill] sm:$0xff] }
  0x96   : > { %v4455_v51 = vpack.c.bf16 %v5995_v4, %v5993_v10  ;;  %v5999_v35 = vand.u32 4294901760, %v5998_v50  ;;  %v6001_v19 = vand.u32 4294901760, %v6000_v39  ;;  %v6003_v25 = vand.u32 4294901760, %v6002_v62  ;;  %v6016_v31 = vld [vmem:[#allocation12_spill] sm:$0xff]  ;;  %v6020_v28 = vld [vmem:[#allocation22_spill] sm:$0xff] }
  0x97   : > { %v6007_v10 = vand.u32 4294901760, %v6006_v14  ;;  %v6009_v50 = vand.u32 4294901760, %v4233_v60  ;;  %v6011_v4 = vand.u32 4294901760, %v6010_v37  ;;  %v6018_v60 = vld [vmem:[#allocation13_spill] sm:$0xff] }
  0x98   : > { %v4461_v1 = vpack.c.bf16 %v5999_v35, %v5997_v26  ;;  %v4468_v18 = vpack.c.bf16 %v6003_v25, %v6001_v19  ;;  %v6012_v35 = vld [vmem:[#allocation11_spill] sm:$0xff]  ;;  %v6014_v19 = vand.u32 4294901760, %v4241_v17  ;;  %v6015_v25 = vand.u32 4294901760, %v4254_v59 }
  0x99   : > { %v4474_v38 = vpack.c.bf16 %v6007_v10, %v6005_v9  ;;  %v4480_v26 = vpack.c.bf16 %v6009_v50, %v6008_v57  ;;  %v6013_v39 = vand.u32 4294901760, %v6012_v35  ;;  %v6017_v9 = vand.u32 4294901760, %v6016_v31  ;;  %v6022_v50 = vld [vmem:[#allocation23_spill] sm:$0xff] }
  0x9a   : > { %v4492_v23 = vpack.c.bf16 %v6015_v25, %v6014_v19  ;;  %2858 = vmatpush1.bf16.msra.mxu1 %v4468_v18  ;;  %v6019_v14 = vand.u32 4294901760, %v6018_v60  ;;  %v6021_v57 = vand.u32 4294901760, %v6020_v28  ;;  %v6023_v37 = vand.u32 4294901760, %v6022_v50 }
  0x9b   : > { %v4486_v62 = vpack.c.bf16 %v6013_v39, %v6011_v4  ;;  %v6024_v17 = vand.u32 4294901760, %v3864_v27  ;;  %v6025_v59 = vand.u32 4294901760, %v3873_v52  ;;  %v6027_v39 = vand.u32 4294901760, %v3880_v47 }
  0x9c   : > { %v4499_v10 = vpack.c.bf16 %v6019_v14, %v6017_v9  ;;  %v4505_v4 = vpack.c.bf16 %v6023_v37, %v6021_v57  ;;  %v6028_v19 = vand.u32 4294901760, %v3885_v30  ;;  %v6030_v31 = vpack.c.bf16 %v3794_v42, %v3785_v34 }
  0x9d   : > { %v4511_v35 = vpack.c.bf16 %v6025_v59, %v6024_v17  ;;  %2860 = vmatprep.subr.bf16.mxu1 %v4486_v62  ;;  %v6031_v9 = vand.u32 4294901760, %v3894_v21  ;;  %v6032_v60 = vand.u32 4294901760, %v3905_v63  ;;  %v6034_v28 = vand.u32 4294901760, %v3915_v36 }
  0x9e   : > { %v4517_v25 = vpack.c.bf16 %v6028_v19, %v6027_v39  ;;  %2970 = vmatpush1.bf16.msra.mxu0 %v6030_v31  ;;  %v6035_v57 = vand.u32 4294901760, %v3933_v11  ;;  %v6037_v37 = vand.u32 4294901760, %v3955_v49  ;;  %v6038_v17 = vand.u32 4294901760, %v3970_v32  ;;  %2862 = vmatpush1.bf16.msra.mxu1 %v4499_v10 }
  0x9f   : > { %6026 = vst [vmem:[#allocation42_spill] sm:$0xff] %v4511_v35  ;;  %v4527_v14 = vpack.c.bf16 %v6032_v60, %v6031_v9  ;;  %v6040_v39 = vand.u32 4294901760, %v3976_v55  ;;  %v6041_v19 = vand.u32 4294901760, %v3981_v54  ;;  %v6043_v9 = vpack.c.bf16 %v3805_v46, %v3799_v43  ;;  %2864 = vmatprep.subr.bf16.mxu1 %v4505_v4 }
  0xa0   : > { %6029 = vst [vmem:[#allocation43_spill] sm:$0xff] %v4517_v25  ;;  %v4533_v50 = vpack.c.bf16 %v6035_v57, %v6034_v28  ;;  %v4539_v59 = vpack.c.bf16 %v6038_v17, %v6037_v37  ;;  %v6044_v60 = vand.u32 4294901760, %v3993_v56  ;;  %v6045_v28 = vand.u32 4294901760, %v4001_v13 }
  0xa1   : > { %6033 = vst [vmem:[#allocation44_spill] sm:$0xff] %v4527_v14  ;;  %v4545_v31 = vpack.c.bf16 %v6041_v19, %v6040_v39  ;;  %2972 = vmatprep.subr.bf16.mxu0 %v6043_v9  ;;  %v6048_v37 = vand.u32 4294901760, %v4030_v5  ;;  %v6051_v39 = vand.u32 4294901760, %v4059_v33  ;;  %v6053_v9 = vand.u32 4294901760, %v4073_v12 }
  0xa2   : > { %6036 = vst [vmem:[#allocation45_spill] sm:$0xff] %v4533_v50  ;;  %6039 = vst [vmem:[#allocation46_spill] sm:$0xff] %v4539_v59  ;;  %v4554_v57 = vpack.c.bf16 %v6045_v28, %v6044_v60  ;;  %v6047_v50 = vand.u32 4294901760, %v4020_v7  ;;  %v6050_v59 = vand.u32 4294901760, %v4051_v53  ;;  %v6056_v60 = vand.u32 4294901760, %v4089_v44 }
  0xa3   : > { %6042 = vst [vmem:[#allocation47_spill] sm:$0xff] %v4545_v31  ;;  %v6054_v31 = vand.u32 4294901760, %v4078_v24  ;;  %v6057_v28 = vand.u32 4294901760, %v4106_v8 }
  0xa4   : > { %6046 = vst [vmem:[#allocation48_spill] sm:$0xff] %v4554_v57  ;;  %v4560_v17 = vpack.c.bf16 %v6048_v37, %v6047_v50  ;;  %v4566_v19 = vpack.c.bf16 %v6051_v39, %v6050_v59  ;;  %v6059_v50 = vand.u32 4294901760, %v4118_v3  ;;  %v6060_v37 = vand.u32 4294901760, %v4130_v2 }
  0xa5   : > { %v4572_v14 = vpack.c.bf16 %v6054_v31, %v6053_v9  ;;  %v4578_v57 = vpack.c.bf16 %v6057_v28, %v6056_v60  ;;  %v6062_v59 = vpack.c.bf16 %v3829_v40, %v3811_v48  ;;  %v6063_v31 = vld [vmem:[#allocation24_spill] sm:$0xff]  ;;  %v6065_v9 = vld [vmem:[#allocation25_spill] sm:$0xff]  ;;  %v6075_v40 = vld [vmem:[#allocation27_spill] sm:$0xff] }
  0xa6   : > { %6049 = vst [vmem:[#allocation49_spill] sm:$0xff] %v4560_v17  ;;  %6052 = vst [vmem:[#allocation50_spill] sm:$0xff] %v4566_v19  ;;  %v4584_v17 = vpack.c.bf16 %v6060_v37, %v6059_v50  ;;  %v6064_v39 = vand.u32 4294901760, %v6063_v31  ;;  %v6067_v28 = vld [vmem:[#allocation65_spill] sm:$0xff]  ;;  %v6069_v19 = vld [vmem:[#allocation66_spill] sm:$0xff]  ;;  %v6072_v37 = vpack.c.bf16 %v3873_v52, %v3864_v27  ;;  %v6082_v52 = vpack.c.bf16 %v3885_v30, %v3880_v47 }
  0xa7   : > { %6055 = vst [vmem:[#allocation51_spill] sm:$0xff] %v4572_v14  ;;  %6058 = vst [vmem:[#allocation52_spill] sm:$0xff] %v4578_v57  ;;  %2974 = vmatpush1.bf16.msra.mxu0 %v6062_v59  ;;  %v6066_v14 = vand.u32 4294901760, %v6065_v9  ;;  %v6068_v57 = vand.u32 4294901760, %v6067_v28  ;;  %v6070_v25 = vand.u32 4294901760, %v6069_v19  ;;  %v6076_v59 = vand.u32 4294901760, %v6075_v40 }
  0xa8   : > { %6061 = vst [vmem:[#allocation53_spill] sm:$0xff] %v4584_v17  ;;  %2976 = vmatprep.subr.bf16.mxu0 %v6072_v37  ;;  %v6073_v17 = vld [vmem:[#allocation26_spill] sm:$0xff]  ;;  %v6077_v31 = vld [vmem:[#allocation68_spill] sm:$0xff]  ;;  %v6094_v47 = vld [vmem:[#allocation75_spill] sm:$0xff] }
  0xa9   : > { %v4595_v60 = vpack.c.bf16 %v6066_v14, %v6064_v39  ;;  %v4601_v50 = vpack.c.bf16 %v6070_v25, %v6068_v57  ;;  %v6074_v35 = vand.u32 4294901760, %v6073_v17  ;;  %v6078_v9 = vand.u32 4294901760, %v6077_v31  ;;  %v6079_v14 = vld [vmem:[#allocation70_spill] sm:$0xff]  ;;  %v6083_v27 = vld [vmem:[#allocation28_spill] sm:$0xff]  ;;  %v6085_v57 = vld [vmem:[#allocation31_spill] sm:$0xff] }
  0xaa   : > { %v6080_v39 = vand.u32 4294901760, %v6079_v14  ;;  %v6084_v25 = vand.u32 4294901760, %v6083_v27  ;;  %v6086_v40 = vand.u32 4294901760, %v6085_v57  ;;  %v6087_v17 = vld [vmem:[#allocation71_spill] sm:$0xff]  ;;  %v6095_v30 = vand.u32 4294901760, %v6094_v47 }
  0xab   : > { %6071 = vst [vmem:[#allocation54_spill] sm:$0xff] %v4601_v50  ;;  %v4610_v48 = vpack.c.bf16 %v6076_v59, %v6074_v35  ;;  %2866 = vmatpush1.bf16.msra.mxu1 %v4595_v60  ;;  %2978 = vmatpush1.bf16.msra.mxu0 %v6082_v52  ;;  %v6088_v37 = vand.u32 4294901760, %v6087_v17  ;;  %v6089_v59 = vld [vmem:[#allocation73_spill] sm:$0xff]  ;;  %v6096_v27 = vpack.c.bf16 %v3933_v11, %v3915_v36 }
  0xac   : > { %v4616_v46 = vpack.c.bf16 %v6080_v39, %v6078_v9  ;;  %v4627_v35 = vpack.c.bf16 %v6086_v40, %v6084_v25  ;;  %v6090_v50 = vand.u32 4294901760, %v6089_v59  ;;  %v6091_v39 = vpack.c.bf16 %v3905_v63, %v3894_v21 }
  0xad   : > { %2868 = vmatprep.subr.bf16.mxu1 %v4610_v48  ;;  %v6098_v25 = vand.u32 4294901760, %v4264_v41  ;;  %v6099_v63 = vpack.c.bf16 %v3970_v32, %v3955_v49  ;;  %v6102_v40 = vand.u32 4294901760, %v4282_v6  ;;  %v6103_v36 = vpack.c.bf16 %v3981_v54, %v3976_v55  ;;  %v6105_v49 = vld [vmem:[#allocation36_spill] sm:$0xff]  ;;  %v6106_v32 = vld [vmem:[#allocation37_spill] sm:$0xff]  ;;  %v6110_v55 = vld [vmem:[#allocation39_spill] sm:$0xff] }
  0xae   : > { %6081 = vst [vmem:[#allocation55_spill] sm:$0xff] %v4616_v46  ;;  %v4633_v9 = vpack.c.bf16 %v6090_v50, %v6088_v37  ;;  %2980 = vmatprep.subr.bf16.mxu0 %v6091_v39  ;;  %v6092_v46 = vld [vmem:[#allocation74_spill] sm:$0xff]  ;;  %v6097_v50 = vand.u32 4294901760, %v4259_v22  ;;  %v6104_v11 = vpack.c.bf16 %v4001_v13, %v3993_v56  ;;  %v6107_v39 = vpack.c.bf16 %v4030_v5, %v4020_v7  ;;  %v6114_v54 = vld [vmem:[#allocation40_spill] sm:$0xff] }
  0xaf   : > { %v6093_v43 = vand.u32 4294901760, %v6092_v46  ;;  %2870 = vmatpush1.bf16.msra.mxu1 %v4627_v35  ;;  %2982 = vmatpush1.bf16.msra.mxu0 %v6096_v27  ;;  %v6109_v27 = vld [vmem:[#allocation38_spill] sm:$0xff]  ;;  %v6111_v13 = vpack.c.bf16 %v4078_v24, %v4073_v12  ;;  %v6112_v56 = vpack.c.bf16 %v4106_v8, %v4089_v44  ;;  %v2999_v5 = vpack.c.bf16 %v6069_v19, %v6067_v28  ;;  %v6115_v12 = vld [vmem:[#allocation41_spill] sm:$0xff]  ;;  %v6116_v44 = vld [vmem:[#allocation79_spill] sm:$0xff] }
  0xb0   : > { %2872 = vmatprep.subr.bf16.mxu1 %v4375_v29  ;;  %v4653_v21 = vpack.c.bf16 %v6098_v25, %v6097_v50  ;;  %2984 = vmatprep.subr.bf16.mxu0 %v6099_v63  ;;  %v6113_v7 = vpack.c.bf16 %v4130_v2, %v4118_v3  ;;  %v3003_v24 = vpack.c.bf16 %v6089_v59, %v6087_v17  ;;  %v6117_v8 = vld [vmem:[#allocation78_spill] sm:$0xff]  ;;  %v6120_v28 = vld [vmem:[#allocation84_spill] sm:$0xff]  ;;  %v473_v17 = vand.u32 4294901760, %v4362_v15 }
  0xb1   : > { %v4642_v52 = vpack.c.bf16 %v6095_v30, %v6093_v43  ;;  %v6100_v43 = vld [vmem:[#allocation76_spill] sm:$0xff]  ;;  %v6108_v30 = vpack.c.bf16 %v4059_v33, %v4051_v53  ;;  %v3001_v53 = vpack.c.bf16 %v6079_v14, %v6077_v31  ;;  %v3005_v33 = vpack.c.bf16 %v6094_v47, %v6092_v46  ;;  %v6118_v46 = vld [vmem:[#allocation82_spill] sm:$0xff]  ;;  %v6122_v31 = vld [vmem:[#allocation81_spill] sm:$0xff] }
  0xb2   : > { %v6101_v57 = vand.u32 4294901760, %v6100_v43  ;;  %v3007_v3 = vpack.c.bf16 %v4264_v41, %v4259_v22  ;;  %v3009_v2 = vpack.c.bf16 %v4282_v6, %v6100_v43  ;;  %v4712_v19 = vsub.f32 %v6117_v8, %v6116_v44  ;;  %v6119_v22 = vld [vmem:[#allocation80_spill] sm:$0xff]  ;;  %v6121_v6 = vld [vmem:[#allocation83_spill] sm:$0xff] }
  0xb3   : > { %2874 = vmatpush1.bf16.msra.mxu1 %v4381_v45  ;;  %2986 = vmatpush1.bf16.msra.mxu0 %v6103_v36  ;;  %v4717_v41 = vsub.f32 %v6119_v22, %v6118_v46  ;;  %v4724_v14 = vsub.f32 %v6122_v31, %v6121_v6  ;;  %v474_v47 = vsub.f32 %v4362_v15, %v473_v17  ;;  %v1551_v22 = vld [vmem:[%s5558_s3 + $0x10] sm:$0xff]  ;;  %v1552_v31 = vld [vmem:[%s5558_s3 + $0x18] sm:$0xff] }
  0xb4   : > { %v4662_v37 = vpack.c.bf16 %v6102_v40, %v6101_v57  ;;  %2876 = vmatprep.subr.bf16.mxu1 %v4387_v58  ;;  %2988 = vmatprep.subr.bf16.mxu0 %v6104_v11  ;;  %v5749_v59 = vand.u32 4294901760, %v4712_v19 }
  0xb5   : > { %v475_v25 = vand.u32 4294901760, %v474_v47  ;;  %v5748_v63 = vand.u32 4294901760, %v4717_v41  ;;  %v5747_v57 = vand.u32 4294901760, %v4724_v14 }
  0xb6   : > { %v480_v50 = vsub.f32 %v4712_v19, %v5749_v59 }
  0xb7   : > { %2878 = vmatpush1.bf16.msra.mxu1 %v6105_v49  ;;  %2990 = vmatpush1.bf16.msra.mxu0 %v6107_v39  ;;  %v490_v15 = vsub.f32 %v4717_v41, %v5748_v63  ;;  %v496_v40 = vsub.f32 %v4724_v14, %v5747_v57  ;;  %v1565_v39 = vld [vmem:[%s5558_s3 + $0x80] sm:$0xff]  ;;  %v1595_v57 = vand.u32 4294901760, %v1551_v22  ;;  %v1598_v63 = vand.u32 4294901760, %v1552_v31 }
  0xb8   : > { %2880 = vmatprep.subr.bf16.mxu1 %v6106_v32  ;;  %2992 = vmatprep.subr.bf16.mxu0 %v6108_v30  ;;  %v481_v43 = vand.u32 4294901760, %v480_v50  ;;  %v1566_v30 = vld [vmem:[%s5558_s3 + $0x88] sm:$0xff] }
  0xb9   : > { %476 = vmatprep.mubr.f32.mxu1 %v475_v25  ;;  %v491_v36 = vand.u32 4294901760, %v490_v15  ;;  %v497_v11 = vand.u32 4294901760, %v496_v40  ;;  %v1570_v15 = vld [vmem:[%s5558_s3 + $0xa8] sm:$0xff]  ;;  %v1553_v40 = vld [vmem:[%s5558_s3 + $0x20] sm:$0xff] }
  0xbb   : > { %2882 = vmatpush1.bf16.msra.mxu1 %v6109_v27  ;;  %2994 = vmatpush1.bf16.msra.mxu0 %v6111_v13  ;;  %v1549_v13 = vld [vmem:[%s5558_s3] sm:$0xff] }
  0xbc   : > { %2884 = vmatprep.subr.bf16.mxu1 %v6110_v55  ;;  %2996 = vmatprep.subr.bf16.mxu0 %v6112_v56  ;;  %v1637_v56 = vand.u32 4294901760, %v1565_v39 }
  0xbe   : > { %v4791_v50 = vsub.f32 %v1565_v39, %v1637_v56 }
  0xbf   : > { %2886 = vmatpush1.bf16.msra.mxu1 %v4417_v20  ;;  %2998 = vmatpush1.bf16.msra.mxu0 %v6113_v7  ;;  %v1550_v7 = vld [vmem:[%s5558_s3 + $0x8] sm:$0xff] }
  0xc0   : > { %2888 = vmatprep.subr.bf16.mxu1 %v4423_v16  ;;  %3000 = vmatprep.subr.bf16.mxu0 %v2999_v5  ;;  %v1640_v5 = vand.u32 4294901760, %v1566_v30 }
  0xc2   : > { %v4789_v47 = vpack.c.bf16 %v1640_v5, %v1637_v56  ;;  %v4793_v25 = vsub.f32 %v1566_v30, %v1640_v5  ;;  %v1571_v56 = vld [vmem:[%s5558_s3 + $0xb0] sm:$0xff] }
  0xc3   : > { %2890 = vmatpush1.bf16.msra.mxu1 %v6114_v54  ;;  %3002 = vmatpush1.bf16.msra.mxu0 %v3001_v53  ;;  %v1589_v53 = vand.u32 4294901760, %v1549_v13  ;;  %v1655_v59 = vand.u32 4294901760, %v1571_v56 }
  0xc4   : > { %2892 = vmatprep.subr.bf16.mxu1 %v6115_v12  ;;  %3004 = vmatprep.subr.bf16.mxu0 %v3003_v24  ;;  %v1567_v24 = vld [vmem:[%s5558_s3 + $0x90] sm:$0xff]  ;;  %6123 = vst [vmem:[#allocation56_spill] sm:$0xff] %v4789_v47  ;;  %6124 = vst [vmem:[#allocation57_spill] sm:$0xff] %v4793_v25 }
  0xc7   : > { %2894 = vmatpush1.bf16.msra.mxu1 %v4443_v61  ;;  %3006 = vmatpush1.bf16.msra.mxu0 %v3005_v33  ;;  %v1568_v33 = vld [vmem:[%s5558_s3 + $0x98] sm:$0xff] }
  0xc8   : > { %2896 = vmatprep.subr.bf16.mxu1 %v4449_v0  ;;  %3008 = vmatprep.subr.bf16.mxu0 %v3007_v3  ;;  %v1592_v3 = vand.u32 4294901760, %v1550_v7  ;;  %v1646_v8 = vand.u32 4294901760, %v1568_v33 }
  0xca   : > { %v4808_v39 = vsub.f32 %v1550_v7, %v1592_v3  ;;  %v4819_v5 = vsub.f32 %v1568_v33, %v1646_v8  ;;  %v1652_v7 = vand.u32 4294901760, %v1570_v15  ;;  %v4829_v33 = vsub.f32 %v1551_v22, %v1595_v57 }
  0xcb   : > { %2898 = vmatpush1.bf16.msra.mxu1 %v4455_v51  ;;  %3010 = vmatpush1.bf16.msra.mxu0 %v3009_v2  ;;  %v1643_v2 = vand.u32 4294901760, %v1567_v24 }
  0xcc   : > { %2900 = vmatprep.subr.bf16.mxu1 %v4461_v1  ;;  %3012 = vmatprep.subr.bf16.mxu0 %v6120_v28  ;;  %6127 = vst [vmem:[#allocation60_spill] sm:$0xff] %v4808_v39  ;;  %6130 = vst [vmem:[#allocation63_spill] sm:$0xff] %v4819_v5 }
  0xcd   : > { %v4810_v30 = vpack.c.bf16 %v1646_v8, %v1643_v2  ;;  %v4831_v8 = vsub.f32 %v1552_v31, %v1598_v63  ;;  %v6135_v31 = vld [vmem:[#allocation14_spill] sm:$0xff] }
  0xce   : > { %1018 = vmatmul.mubr.f32.vlgmr.msra.gmra.mrb[0].mxu0 %v4712_v19 }
  0xcf   : > { %2902 = vmatpush1.bf16.msra.mxu1 %v4474_v38  ;;  %3014 = vmatpush1.bf16.msra.mxu0 %v4468_v18  ;;  %6128 = vst [vmem:[#allocation61_spill] sm:$0xff] %v4810_v30 }
  0xd0   : > { %2904 = vmatprep.subr.bf16.mxu1 %v4480_v26  ;;  %1025 = vmatprep.mubr.f32.mxu0 %v4717_v41 }
  0xd1   : > { %3016 = vmatprep.subr.bf16.mxu0 %v4486_v62 }
  0xd2   : > { %1028 = vmatmul.mubr.f32.gmra.mrb[2].mxu0 %v4724_v14 }
  0xd3   : > { %2906 = vmatpush1.bf16.msra.mxu1 %v4492_v23  ;;  %3018 = vmatpush1.bf16.msra.mxu0 %v4499_v10 }
  0xd4   : > { %1153 = vmatprep.mubr.f32.mxu0 %v473_v17  ;;  %3020 = vmatprep.subr.bf16.mxu0 %v4505_v4  ;;  %v1569_v17 = vld [vmem:[%s5558_s3 + $0xa0] sm:$0xff] }
  0xd5   : > { %3168 = vmatprep.subr.bf16.mxu1 %v4789_v47  ;;  %v4827_v47 = vpack.c.bf16 %v1598_v63, %v1595_v57 }
  0xd6   : > { %482 = vmatmul.mubr.f32.vlgmr.msra.gmra.mrb[0].mxu1 %v481_v43  ;;  %v4795_v43 = vsub.f32 %v1549_v13, %v1589_v53  ;;  %v4812_v13 = vsub.f32 %v1567_v24, %v1643_v2  ;;  %v1601_v24 = vand.u32 4294901760, %v1553_v40  ;;  %v1572_v2 = vld [vmem:[%s5558_s3 + $0xb8] sm:$0xff] }
  0xd7   : > { %3022 = vmatpush1.bf16.msra.mxu0 %v4595_v60  ;;  %492 = vmatprep.mubr.f32.mxu1 %v491_v36  ;;  %v1554_v36 = vld [vmem:[%s5558_s3 + $0x28] sm:$0xff]  ;;  %6131 = vst [vmem:[#allocation64_spill] sm:$0xff] %v4827_v47  ;;  %v1658_v25 = vand.u32 4294901760, %v1572_v2 }
  0xd8   : > { %3024 = vmatprep.subr.bf16.mxu0 %v4610_v48  ;;  %6125 = vst [vmem:[#allocation58_spill] sm:$0xff] %v4795_v43  ;;  %6129 = vst [vmem:[#allocation62_spill] sm:$0xff] %v4812_v13  ;;  %v4839_v39 = vsub.f32 %v1553_v40, %v1601_v24 }
  0xd9   : > { %v4851_v57 = vpack.c.bf16 %v1658_v25, %v1655_v59  ;;  %v4853_v22 = vsub.f32 %v1572_v2, %v1658_v25  ;;  %v6145_v2 = vld [vmem:[#allocation19_spill] sm:$0xff] }
  0xda   : > { %498 = vmatmul.mubr.f32.gmra.mrb[2].mxu1 %v497_v11  ;;  %v4806_v11 = vpack.c.bf16 %v1592_v3, %v1589_v53  ;;  %v1649_v53 = vand.u32 4294901760, %v1569_v17  ;;  %v1604_v3 = vand.u32 4294901760, %v1554_v36 }
  0xdb   : > { %3026 = vmatpush1.bf16.msra.mxu0 %v4627_v35  ;;  %6134 = vst [vmem:[#allocation9_spill] sm:$0xff] %v4851_v57 }
  0xdc   : > { %3028 = vmatprep.subr.bf16.mxu0 %v4375_v29  ;;  %6126 = vst [vmem:[#allocation59_spill] sm:$0xff] %v4806_v11  ;;  %3170 = vmatpush3.bf16.msra.mxu1 %v4806_v11  ;;  %v4833_v5 = vsub.f32 %v1569_v17, %v1649_v53  ;;  %v4835_v13 = vpack.c.bf16 %v1652_v7, %v1649_v53  ;;  %v6136_v17 = vand.u32 4294901760, %v6135_v31  ;;  %v6141_v53 = vld [vmem:[#allocation17_spill] sm:$0xff] }
  0xdd   : > { %3172 = vmatprep.subr.bf16.mxu1 %v4810_v30  ;;  %v4837_v11 = vsub.f32 %v1570_v15, %v1652_v7  ;;  %v4842_v43 = vsub.f32 %v1554_v36, %v1604_v3  ;;  %v4844_v30 = vsub.f32 %v1571_v56, %v1655_v59  ;;  %v4848_v63 = vpack.c.bf16 %v1604_v3, %v1601_v24  ;;  %v6137_v15 = vld [vmem:[#allocation15_spill] sm:$0xff]  ;;  %v6139_v56 = vld [vmem:[#allocation16_spill] sm:$0xff]  ;;  %v6143_v24 = vld [vmem:[#allocation18_spill] sm:$0xff] }
  0xde   : > { %6132 = vst [vmem:[#allocation67_spill] sm:$0xff] %v4835_v13  ;;  %v6138_v40 = vand.u32 4294901760, %v6137_v15  ;;  %v6140_v59 = vand.u32 4294901760, %v6139_v56  ;;  %v6142_v25 = vand.u32 4294901760, %v6141_v53  ;;  %v6144_v3 = vand.u32 4294901760, %v6143_v24  ;;  %v6155_v53 = vld [vmem:[#allocation30_spill] sm:$0xff] }
  0xdf   : > { %3030 = vmatpush1.bf16.msra.mxu0 %v4381_v45  ;;  %6133 = vst [vmem:[#allocation8_spill] sm:$0xff] %v4848_v63  ;;  %v6147_v15 = vand.u32 4294901760, %v4712_v19  ;;  %v6152_v56 = vand.u32 4294901760, %v4717_v41  ;;  %v6158_v19 = vand.u32 4294901760, %v3785_v34  ;;  %v6161_v41 = vld [vmem:[#allocation32_spill] sm:$0xff]  ;;  %v6169_v34 = vld [vmem:[#allocation42_spill] sm:$0xff] }
  0xe0   : > { %3032 = vmatprep.subr.bf16.mxu0 %v4387_v58  ;;  %3174 = vmatpush3.bf16.msra.mxu1 %v4827_v47  ;;  %v3063_v36 = vpack.c.bf16 %v6138_v40, %v6136_v17  ;;  %v3065_v7 = vpack.c.bf16 %v6142_v25, %v6140_v59  ;;  %v6148_v17 = vld [vmem:[#allocation20_spill] sm:$0xff]  ;;  %v6153_v59 = vld [vmem:[#allocation29_spill] sm:$0xff]  ;;  %v6156_v25 = vand.u32 4294901760, %v6155_v53  ;;  %v6173_v53 = vld [vmem:[#allocation46_spill] sm:$0xff] }
  0xe1   : > { %3176 = vmatprep.subr.bf16.mxu1 %v4835_v13  ;;  %v6146_v13 = vand.u32 4294901760, %v6145_v2  ;;  %v6149_v40 = vand.u32 4294901760, %v6148_v17  ;;  %v6163_v2 = vld [vmem:[#allocation33_spill] sm:$0xff]  ;;  %v6165_v17 = vld [vmem:[#allocation34_spill] sm:$0xff] }
  0xe3   : > { %3034 = vmatpush1.bf16.msra.mxu0 %v6105_v49  ;;  %v3067_v31 = vpack.c.bf16 %v6146_v13, %v6144_v3  ;;  %v6157_v13 = vand.u32 4294901760, %v4724_v14 }
  0xe4   : > { %3036 = vmatprep.subr.bf16.mxu0 %v6106_v32  ;;  %3178 = vmatpush3.bf16.msra.mxu1 %v4848_v63 }
  0xe5   : > { %3180 = vmatprep.subr.bf16.mxu1 %v4851_v57  ;;  %v6150_v57 = vld [vmem:[#allocation21_spill] sm:$0xff] }
  0xe6   : > { %v6151_v63 = vand.u32 4294901760, %v6150_v57  ;;  %v6160_v57 = vld [vmem:[#allocation77_spill] sm:$0xff] }
  0xe7   : > { %3038 = vmatpush1.bf16.msra.mxu0 %v6109_v27 }
  0xe8   : > { %3040 = vmatprep.subr.bf16.mxu0 %v6110_v55  ;;  %v3069_v47 = vpack.c.bf16 %v6151_v63, %v6149_v40  ;;  %v6162_v63 = vand.u32 4294901760, %v6161_v41  ;;  %v6166_v40 = vand.u32 4294901760, %v6165_v17  ;;  %v6180_v41 = vld [vmem:[#allocation53_spill] sm:$0xff] }
  0xe9   : > { %v1562_v17 = vld [vmem:[%s5558_s3 + $0x68] sm:$0xff] }
  0xeb   : > { %3042 = vmatpush1.bf16.msra.mxu0 %v4417_v20 }
  0xec   : > { %3044 = vmatprep.subr.bf16.mxu0 %v4423_v16 }
  0xef   : > { %3046 = vmatpush1.bf16.msra.mxu0 %v6114_v54 }
  0xf0   : > { %3048 = vmatprep.subr.bf16.mxu0 %v6115_v12 }
  0xf3   : > { %3050 = vmatpush1.bf16.msra.mxu0 %v4443_v61 }
  0xf4   : > { %3052 = vmatprep.subr.bf16.mxu0 %v4449_v0 }
  0xf7   : > { %3054 = vmatpush1.bf16.msra.mxu0 %v4455_v51 }
  0xf8   : > { %3056 = vmatprep.subr.bf16.mxu0 %v4461_v1 }
  0xfb   : > { %3058 = vmatpush1.bf16.msra.mxu0 %v4474_v38 }
  0xfc   : > { %3060 = vmatprep.subr.bf16.mxu0 %v4480_v26 }
  0xff   : > { %3062 = vmatpush1.bf16.msra.mxu0 %v4492_v23 }
 0x100   : > { %3064 = vmatprep.subr.bf16.mxu0 %v3063_v36  ;;  %v6154_v36 = vand.u32 4294901760, %v6153_v59 }
 0x102   : > { %1157 = vmatmul.mubr.f32.vlgmr.msra.gmra.mrb[0].mxu0 %v6147_v15  ;;  %v3071_v24 = vpack.c.bf16 %v6156_v25, %v6154_v36  ;;  %v6172_v36 = vld [vmem:[#allocation45_spill] sm:$0xff]  ;;  %v6174_v25 = vld [vmem:[#allocation47_spill] sm:$0xff] }
 0x103   : > { %3066 = vmatpush1.bf16.msra.mxu0 %v3065_v7  ;;  %1165 = vmatprep.mubr.f32.mxu0 %v6152_v56  ;;  %v6159_v7 = vand.u32 4294901760, %v3794_v42  ;;  %v6167_v56 = vld [vmem:[#allocation35_spill] sm:$0xff] }
 0x104   : > { %3068 = vmatprep.subr.bf16.mxu0 %v3067_v31  ;;  %v6164_v31 = vand.u32 4294901760, %v6163_v2  ;;  %v6168_v14 = vand.u32 4294901760, %v6167_v56  ;;  %v6170_v42 = vld [vmem:[#allocation43_spill] sm:$0xff]  ;;  %v1628_v56 = vand.u32 4294901760, %v1562_v17 }
 0x105   : > { %v3073_v3 = vpack.c.bf16 %v6159_v7, %v6158_v19  ;;  %v6177_v19 = vld [vmem:[#allocation50_spill] sm:$0xff]  ;;  %v6178_v7 = vld [vmem:[#allocation51_spill] sm:$0xff] }
 0x106   : > { %1169 = vmatmul.mubr.f32.gmra.mrb[2].mxu0 %v6157_v13  ;;  %v3075_v15 = vpack.c.bf16 %v6164_v31, %v6162_v63  ;;  %v3077_v59 = vpack.c.bf16 %v6168_v14, %v6166_v40  ;;  %v6176_v13 = vld [vmem:[#allocation49_spill] sm:$0xff]  ;;  %v6181_v63 = vld [vmem:[#allocation54_spill] sm:$0xff]  ;;  %v6182_v2 = vld [vmem:[#allocation55_spill] sm:$0xff] }
 0x107   : > { %3070 = vmatpush1.bf16.msra.mxu0 %v3069_v47  ;;  %1396 = vmatprep.mubr.f32.mxu0 %v6160_v57  ;;  %v6171_v47 = vld [vmem:[#allocation44_spill] sm:$0xff] }
 0x108   : > { %3072 = vmatprep.subr.bf16.mxu0 %v3071_v24  ;;  %v6175_v24 = vld [vmem:[#allocation48_spill] sm:$0xff] }
 0x10b   : > { %3074 = vmatpush1.bf16.msra.mxu0 %v3073_v3  ;;  %v6179_v3 = vld [vmem:[#allocation52_spill] sm:$0xff] }
 0x10c   : > { %3076 = vmatprep.subr.bf16.mxu0 %v3075_v15  ;;  %v1561_v15 = vld [vmem:[%s5558_s3 + $0x60] sm:$0xff] }
 0x10d   : > { %v1625_v40 = vand.u32 4294901760, %v1561_v15 }
 0x10f   : > { %3078 = vmatpush1.bf16.msra.mxu0 %v3077_v59  ;;  %v5021_v59 = vpack.c.bf16 %v1628_v56, %v1625_v40 }
 0x110   : > { %3080 = vmatprep.subr.bf16.mxu0 %v6169_v34  ;;  %v1579_v34 = vld [vmem:[%s5558_s3 + $0xf0] sm:$0xff] }
 0x111   : > { %6190 = vst [vmem:[#allocation23_spill] sm:$0xff] %v5021_v59 }
 0x113   : > { %3082 = vmatpush1.bf16.msra.mxu0 %v6170_v42  ;;  %v1580_v42 = vld [vmem:[%s5558_s3 + $0xf8] sm:$0xff] }
 0x114   : > { %3084 = vmatprep.subr.bf16.mxu0 %v6171_v47  ;;  %v1679_v47 = vand.u32 4294901760, %v1579_v34 }
 0x117   : > { %3086 = vmatpush1.bf16.msra.mxu0 %v6172_v36  ;;  %v1682_v36 = vand.u32 4294901760, %v1580_v42 }
 0x118   : > { %3088 = vmatprep.subr.bf16.mxu0 %v6173_v53  ;;  %v1563_v53 = vld [vmem:[%s5558_s3 + $0x70] sm:$0xff] }
 0x11b   : > { %3090 = vmatpush1.bf16.msra.mxu0 %v6174_v25  ;;  %v1564_v25 = vld [vmem:[%s5558_s3 + $0x78] sm:$0xff] }
 0x11c   : > { %3092 = vmatprep.subr.bf16.mxu0 %v6175_v24  ;;  %v5781_v24 = vand.u32 4294901760, %v4791_v50 }
 0x11f   : > { %3094 = vmatpush1.bf16.msra.mxu0 %v6176_v13  ;;  %v6191_v13 = vld [vmem:[#allocation57_spill] sm:$0xff] }
 0x120   : > { %3096 = vmatprep.subr.bf16.mxu0 %v6177_v19  ;;  %v5784_v19 = vand.u32 4294901760, %v6191_v13 }
 0x123   : > { %3098 = vmatpush1.bf16.msra.mxu0 %v6178_v7  ;;  %v1631_v7 = vand.u32 4294901760, %v1563_v53 }
 0x124   : > { %3100 = vmatprep.subr.bf16.mxu0 %v6179_v3  ;;  %v1634_v3 = vand.u32 4294901760, %v1564_v25 }
 0x127   : > { %3102 = vmatpush1.bf16.msra.mxu0 %v6180_v41  ;;  %v6192_v41 = vld [vmem:[#allocation58_spill] sm:$0xff] }
 0x128   : > { %3104 = vmatprep.subr.bf16.mxu0 %v6181_v63  ;;  %v5787_v63 = vand.u32 4294901760, %v6192_v41 }
 0x12b   : > { %3106 = vmatpush1.bf16.msra.mxu0 %v6182_v2  ;;  %v6193_v2 = vld [vmem:[#allocation60_spill] sm:$0xff] }
 0x12c   : > { %3108 = vmatprep.subr.bf16.mxu0 %v4633_v9  ;;  %v1555_v9 = vld [vmem:[%s5558_s3 + $0x30] sm:$0xff] }
 0x12f   : > { %3110 = vmatpush1.bf16.msra.mxu0 %v4642_v52  ;;  %v1556_v52 = vld [vmem:[%s5558_s3 + $0x38] sm:$0xff] }
 0x130   : > { %3112 = vmatprep.subr.bf16.mxu0 %v4653_v21  ;;  %v1610_v21 = vand.u32 4294901760, %v1556_v52 }
 0x133   : > { %3114 = vmatpush1.bf16.msra.mxu0 %v4662_v37 }
 0x134   : > { %3116 = vmatprep.subr.bf16.mxu0 %v6120_v28  ;;  %v4936_v28 = vsub.f32 %v1556_v52, %v1610_v21  ;;  %v5041_v52 = vpack.c.bf16 %v1682_v36, %v1679_v47 }
 0x136   : > { %1398 = vmatmul.mubr.f32.vlgmr.msra.gmra.mrb[0].mxu0 %v6116_v44  ;;  %6194 = vst [vmem:[#allocation24_spill] sm:$0xff] %v5041_v52 }
 0x137   : > { %3118 = vmatpush1.bf16.msra.mxu0 %v4468_v18  ;;  %1404 = vmatprep.mubr.f32.mxu0 %v6118_v46  ;;  %v1607_v18 = vand.u32 4294901760, %v1555_v9 }
 0x138   : > { %3120 = vmatprep.subr.bf16.mxu0 %v4486_v62 }
 0x139   : > { %v4932_v37 = vpack.c.bf16 %v1610_v21, %v1607_v18  ;;  %v4934_v62 = vsub.f32 %v1555_v9, %v1607_v18  ;;  %v1831_v18 = vsub.f32 %v4791_v50, %v5781_v24  ;;  %v1838_v21 = vsub.f32 %v6191_v13, %v5784_v19 }
 0x13a   : > { %1406 = vmatmul.mubr.f32.gmra.mrb[2].mxu0 %v6121_v6  ;;  %v1719_v9 = vsub.f32 %v6192_v41, %v5787_v63 }
 0x13b   : > { %3122 = vmatpush1.bf16.msra.mxu0 %v4499_v10  ;;  %1529 = vmatprep.mubr.f32.mxu0 %v6160_v57  ;;  %6183 = vst [vmem:[#allocation69_spill] sm:$0xff] %v4932_v37  ;;  %v1576_v10 = vld [vmem:[%s5558_s3 + $0xd8] sm:$0xff] }
 0x13c   : > { %3124 = vmatprep.subr.bf16.mxu0 %v4505_v4  ;;  %3182 = vmatpush3.bf16.msra.mxu1 %v4932_v37 }
 0x13f   : > { %3126 = vmatpush1.bf16.msra.mxu0 %v4595_v60  ;;  %v1670_v60 = vand.u32 4294901760, %v1576_v10 }
 0x140   : > { %3128 = vmatprep.subr.bf16.mxu0 %v4610_v48  ;;  %v1574_v48 = vld [vmem:[%s5558_s3 + $0xc8] sm:$0xff] }
 0x143   : > { %3130 = vmatpush1.bf16.msra.mxu0 %v4627_v35  ;;  %v1559_v35 = vld [vmem:[%s5558_s3 + $0x50] sm:$0xff] }
 0x144   : > { %3132 = vmatprep.subr.bf16.mxu0 %v4375_v29  ;;  %v1573_v29 = vld [vmem:[%s5558_s3 + $0xc0] sm:$0xff] }
 0x147   : > { %3134 = vmatpush1.bf16.msra.mxu0 %v4381_v45  ;;  %v1661_v45 = vand.u32 4294901760, %v1573_v29 }
 0x148   : > { %3136 = vmatprep.subr.bf16.mxu0 %v4387_v58  ;;  %v1664_v58 = vand.u32 4294901760, %v1574_v48 }
 0x14a   : > { %v5060_v24 = vsub.f32 %v1574_v48, %v1664_v58  ;;  %v5079_v48 = vsub.f32 %v1561_v15, %v1625_v40 }
 0x14b   : > { %3138 = vmatpush1.bf16.msra.mxu0 %v6105_v49  ;;  %v1560_v49 = vld [vmem:[%s5558_s3 + $0x58] sm:$0xff] }
 0x14c   : > { %3140 = vmatprep.subr.bf16.mxu0 %v6106_v32  ;;  %v1619_v32 = vand.u32 4294901760, %v1559_v35  ;;  %6197 = vst [vmem:[#allocation65_spill] sm:$0xff] %v5079_v48 }
 0x14f   : > { %3142 = vmatpush1.bf16.msra.mxu0 %v6109_v27  ;;  %v1622_v27 = vand.u32 4294901760, %v1560_v49 }
 0x150   : > { %3144 = vmatprep.subr.bf16.mxu0 %v6110_v55 }
 0x151   : > { %v5073_v63 = vsub.f32 %v1560_v49, %v1622_v27 }
 0x153   : > { %3146 = vmatpush1.bf16.msra.mxu0 %v4417_v20  ;;  %v1557_v20 = vld [vmem:[%s5558_s3 + $0x40] sm:$0xff] }
 0x154   : > { %3148 = vmatprep.subr.bf16.mxu0 %v4423_v16  ;;  %v1558_v16 = vld [vmem:[%s5558_s3 + $0x48] sm:$0xff] }
 0x157   : > { %3150 = vmatpush1.bf16.msra.mxu0 %v6114_v54 }
 0x158   : > { %3152 = vmatprep.subr.bf16.mxu0 %v6115_v12 }
 0x15b   : > { %3154 = vmatpush1.bf16.msra.mxu0 %v4443_v61  ;;  %v1613_v61 = vand.u32 4294901760, %v1557_v20 }
 0x15c   : > { %3156 = vmatprep.subr.bf16.mxu0 %v4449_v0  ;;  %v1616_v0 = vand.u32 4294901760, %v1558_v16 }
 0x15d   : > { %v5062_v37 = vsub.f32 %v1557_v20, %v1613_v61  ;;  %v5085_v20 = vsub.f32 %v1580_v42, %v1682_v36 }
 0x15e   : > { %v5064_v19 = vsub.f32 %v1558_v16, %v1616_v0  ;;  %v5087_v16 = vsub.f32 %v1563_v53, %v1631_v7 }
 0x15f   : > { %3158 = vmatpush1.bf16.msra.mxu0 %v4455_v51  ;;  %6199 = vst [vmem:[#allocation26_spill] sm:$0xff] %v5085_v20 }
 0x160   : > { %3160 = vmatprep.subr.bf16.mxu0 %v4461_v1  ;;  %6200 = vst [vmem:[#allocation27_spill] sm:$0xff] %v5087_v16 }
 0x163   : > { %3162 = vmatpush1.bf16.msra.mxu0 %v4474_v38  ;;  %v4979_v38 = vpack.c.bf16 %v1664_v58, %v1661_v45  ;;  %v5083_v58 = vsub.f32 %v1579_v34, %v1679_v47  ;;  %v5791_v34 = vand.u32 4294901760, %v4842_v43 }
 0x164   : > { %3164 = vmatprep.subr.bf16.mxu0 %v4480_v26  ;;  %v4981_v26 = vpack.c.bf16 %v1616_v0, %v1613_v61  ;;  %v5089_v61 = vsub.f32 %v1564_v25, %v1634_v3 }
 0x165   : > { %6184 = vst [vmem:[#allocation72_spill] sm:$0xff] %v4979_v38  ;;  %3184 = vmatprep.subr.bf16.mxu1 %v4979_v38  ;;  %v5058_v38 = vsub.f32 %v1573_v29, %v1661_v45  ;;  %v5081_v45 = vsub.f32 %v1562_v17, %v1628_v56  ;;  %6198 = vst [vmem:[#allocation66_spill] sm:$0xff] %v5083_v58 }
 0x166   : > { %6185 = vst [vmem:[#allocation10_spill] sm:$0xff] %v4981_v26  ;;  %3186 = vmatpush3.bf16.msra.mxu1 %v4981_v26  ;;  %6201 = vst [vmem:[#allocation68_spill] sm:$0xff] %v5089_v61 }
 0x167   : > { %3166 = vmatpush1.bf16.msra.mxu0 %v4492_v23  ;;  %v1575_v23 = vld [vmem:[%s5558_s3 + $0xd0] sm:$0xff] }
 0x168   : > { %v1667_v4 = vand.u32 4294901760, %v1575_v23 }
 0x16a   : > { %1531 = vmatmul.mubr.f32.vlgmr.msra.gmra.mrb[0].mxu0 %v6116_v44  ;;  %v4999_v54 = vpack.c.bf16 %v1670_v60, %v1667_v4  ;;  %v5003_v44 = vpack.c.bf16 %v1622_v27, %v1619_v32  ;;  %v5803_v27 = vand.u32 4294901760, %v4831_v8 }
 0x16b   : > { %1537 = vmatprep.mubr.f32.mxu0 %v6118_v46  ;;  %v1577_v46 = vld [vmem:[%s5558_s3 + $0xe0] sm:$0xff] }
 0x16c   : > { %6186 = vst [vmem:[#allocation11_spill] sm:$0xff] %v4999_v54  ;;  %6188 = vst [vmem:[#allocation13_spill] sm:$0xff] %v5003_v44  ;;  %3188 = vmatprep.subr.bf16.mxu1 %v4999_v54  ;;  %v1673_v57 = vand.u32 4294901760, %v1577_v46  ;;  %v6196_v54 = vand.u32 4294901760, %v6193_v2  ;;  %v1740_v15 = vsub.f32 %v4831_v8, %v5803_v27 }
 0x16d   : > { %3190 = vmatpush3.bf16.msra.mxu1 %v5003_v44  ;;  %v1839_v44 = vand.u32 4294901760, %v1838_v21  ;;  %v5069_v21 = vsub.f32 %v1576_v10, %v1670_v60 }
 0x16e   : > { %1539 = vmatmul.mubr.f32.gmra.mrb[2].mxu0 %v6121_v6  ;;  %v1578_v6 = vld [vmem:[%s5558_s3 + $0xe8] sm:$0xff]  ;;  %v1726_v26 = vsub.f32 %v6193_v2, %v6196_v54  ;;  %v5801_v54 = vand.u32 4294901760, %v4833_v5  ;;  %v1741_v36 = vand.u32 4294901760, %v1740_v15 }
 0x16f   : > { %v1676_v31 = vand.u32 4294901760, %v1578_v6 }
 0x170   : > { %v1727_v10 = vand.u32 4294901760, %v1726_v26  ;;  %v5793_v26 = vand.u32 4294901760, %v4839_v39  ;;  %v1859_v17 = vsub.f32 %v4833_v5, %v5801_v54 }
 0x171   : > { %v5019_v14 = vpack.c.bf16 %v1676_v31, %v1673_v57  ;;  %v5077_v29 = vsub.f32 %v1578_v6, %v1676_v31 }
 0x172   : > { %v1860_v53 = vand.u32 4294901760, %v1859_v17  ;;  %v5792_v17 = vand.u32 4294901760, %v4936_v28 }
 0x173   : > { %6189 = vst [vmem:[#allocation22_spill] sm:$0xff] %v5019_v14  ;;  %3192 = vmatprep.subr.bf16.mxu1 %v5019_v14  ;;  %v5049_v14 = vpack.c.bf16 %v1634_v3, %v1631_v7  ;;  %v1754_v3 = vsub.f32 %v4842_v43, %v5791_v34 }
 0x174   : > { %3194 = vmatpush3.bf16.msra.mxu1 %v5021_v59  ;;  %v1832_v59 = vand.u32 4294901760, %v1831_v18  ;;  %v5067_v18 = vsub.f32 %v1575_v23, %v1667_v4  ;;  %v1720_v23 = vand.u32 4294901760, %v1719_v9  ;;  %v6202_v4 = vld [vmem:[#allocation62_spill] sm:$0xff]  ;;  %v5788_v9 = vand.u32 4294901760, %v4844_v30 }
 0x175   : > { %6195 = vst [vmem:[#allocation25_spill] sm:$0xff] %v5049_v14  ;;  %3196 = vmatprep.subr.bf16.mxu1 %v5041_v52  ;;  %v5071_v52 = vsub.f32 %v1559_v35, %v1619_v32  ;;  %v5812_v60 = vand.u32 4294901760, %v6202_v4  ;;  %v6203_v35 = vld [vmem:[#allocation63_spill] sm:$0xff]  ;;  %v5806_v32 = vand.u32 4294901760, %v4829_v33 }
 0x176   : > { %v3199_v0 = vpack.c.bf16 %v1839_v44, %v1832_v59  ;;  %v5807_v49 = vand.u32 4294901760, %v6203_v35  ;;  %v5795_v44 = vand.u32 4294901760, %v4837_v11  ;;  %v1747_v59 = vsub.f32 %v4839_v39, %v5793_v26 }
 0x177   : > { %v1845_v6 = vsub.f32 %v6202_v4, %v5812_v60  ;;  %v1733_v31 = vsub.f32 %v4829_v33, %v5806_v32  ;;  %v1873_v15 = vsub.f32 %v4844_v30, %v5788_v9  ;;  %v5799_v26 = vand.u32 4294901760, %v5069_v21 }
 0x178   : > { %3198 = vmatpush3.bf16.msra.mxu1 %v5049_v14  ;;  %v1866_v56 = vsub.f32 %v4837_v11, %v5795_v44  ;;  %v1748_v7 = vand.u32 4294901760, %v1747_v59  ;;  %v5794_v59 = vand.u32 4294901760, %v5058_v38  ;;  %v5810_v32 = vand.u32 4294901760, %v5083_v58 }
 0x179   : > { %3200 = vmatprep.subr.bf16.mxu1 %v3199_v0  ;;  %v1846_v40 = vand.u32 4294901760, %v1845_v6  ;;  %v1734_v47 = vand.u32 4294901760, %v1733_v31  ;;  %v5790_v6 = vand.u32 4294901760, %v4934_v62  ;;  %v1755_v31 = vand.u32 4294901760, %v1754_v3 }
 0x17a   : > { %v1867_v25 = vand.u32 4294901760, %v1866_v56 }
 0x17b   : > { %v1761_v56 = vsub.f32 %v4934_v62, %v5790_v6 }
 0x17d   : > { %v1762_v9 = vand.u32 4294901760, %v1761_v56 }
 0x1a9   : > { %v4975_v1 = vpop.f32.mrb[0].mxu1 }
 0x1aa   : > { %v4977_v51 = vpop.f32.mrb[1].mxu1 }
 0x1ad   : > { %v4997_v55 = vpop.f32.mrb[2].mxu1 }
 0x1ae   : > { %v5001_v12 = vpop.f32.mrb[3].mxu1 }
 0x1af   : > { %6187 = vst [vmem:[#allocation12_spill] sm:$0xff] %v5001_v12  ;;  %v5075_v12 = vsub.f32 %v1577_v46, %v1673_v57  ;;  %v5096_v46 = vpack.c.bf16 %v1727_v10, %v1720_v23  ;;  %v1852_v57 = vsub.f32 %v6203_v35, %v5807_v49  ;;  %v5128_v23 = vpack.c.bf16 %v1741_v36, %v1734_v47 }
 0x1b0   : > { %v5789_v10 = vand.u32 4294901760, %v4853_v22  ;;  %v5146_v47 = vpack.c.bf16 %v1755_v31, %v1748_v7  ;;  %v1874_v36 = vand.u32 4294901760, %v1873_v15  ;;  %v5798_v31 = vand.u32 4294901760, %v5064_v19 }
 0x1b1   : > { %v1853_v42 = vand.u32 4294901760, %v1852_v57  ;;  %v5132_v57 = vpack.c.bf16 %v1867_v25, %v1860_v53  ;;  %v1768_v53 = vsub.f32 %v4936_v28, %v5792_v17  ;;  %v5796_v25 = vand.u32 4294901760, %v5062_v37 }
 0x1b2   : > { %v5800_v15 = vand.u32 4294901760, %v5067_v18 }
 0x1b3   : > { %v5126_v0 = vpack.c.bf16 %v1853_v42, %v1846_v40  ;;  %v1880_v40 = vsub.f32 %v4853_v22, %v5789_v10  ;;  %v5797_v42 = vand.u32 4294901760, %v5060_v24  ;;  %v1887_v10 = vsub.f32 %v5058_v38, %v5794_v59 }
 0x1b4   : > { %v1769_v34 = vand.u32 4294901760, %v1768_v53  ;;  %v1775_v7 = vsub.f32 %v5062_v37, %v5796_v25  ;;  %v1782_v53 = vsub.f32 %v5064_v19, %v5798_v31  ;;  %v1901_v25 = vsub.f32 %v5067_v18, %v5800_v15 }
 0x1b5   : > { %v1881_v3 = vand.u32 4294901760, %v1880_v40  ;;  %v1894_v6 = vsub.f32 %v5060_v24, %v5797_v42  ;;  %v1888_v40 = vand.u32 4294901760, %v1887_v10  ;;  %v1908_v10 = vsub.f32 %v5069_v21, %v5799_v26 }
 0x1b6   : > { %v5166_v59 = vpack.c.bf16 %v1769_v34, %v1762_v9  ;;  %v1776_v44 = vand.u32 4294901760, %v1775_v7  ;;  %v5804_v34 = vand.u32 4294901760, %v5073_v63  ;;  %v1783_v9 = vand.u32 4294901760, %v1782_v53 }
 0x1b7   : > { %v5163_v17 = vpack.c.bf16 %v1881_v3, %v1874_v36  ;;  %v1895_v56 = vand.u32 4294901760, %v1894_v6  ;;  %v5802_v6 = vand.u32 4294901760, %v5071_v52  ;;  %v1902_v36 = vand.u32 4294901760, %v1901_v25 }
 0x1b8   : > { %v5805_v3 = vand.u32 4294901760, %v5075_v12  ;;  %v5808_v7 = vand.u32 4294901760, %v5077_v29  ;;  %v1909_v31 = vand.u32 4294901760, %v1908_v10  ;;  %v5811_v26 = vand.u32 4294901760, %v5079_v48 }
 0x1b9   : > { %v5174_v42 = vpack.c.bf16 %v1895_v56, %v1888_v40  ;;  %v1789_v40 = vsub.f32 %v5071_v52, %v5802_v6  ;;  %v1796_v56 = vsub.f32 %v5073_v63, %v5804_v34  ;;  %v5190_v15 = vpack.c.bf16 %v1783_v9, %v1776_v44 }
 0x1ba   : > { %v1915_v25 = vsub.f32 %v5075_v12, %v5805_v3  ;;  %v1922_v53 = vsub.f32 %v5077_v29, %v5808_v7  ;;  %v5809_v10 = vand.u32 4294901760, %v5081_v45  ;;  %v5199_v54 = vpack.c.bf16 %v1909_v31, %v1902_v36 }
 0x1bb   : > { %v1790_v6 = vand.u32 4294901760, %v1789_v40  ;;  %v1797_v27 = vand.u32 4294901760, %v1796_v56  ;;  %v1803_v34 = vsub.f32 %v5079_v48, %v5811_v26  ;;  %v5813_v31 = vand.u32 4294901760, %v5085_v20 }
 0x1bc   : > { %v1916_v44 = vand.u32 4294901760, %v1915_v25  ;;  %v1923_v9 = vand.u32 4294901760, %v1922_v53  ;;  %v1810_v3 = vsub.f32 %v5081_v45, %v5809_v10  ;;  %v5814_v36 = vand.u32 4294901760, %v5087_v16 }
 0x1bd   : > { %v5208_v49 = vpack.c.bf16 %v1797_v27, %v1790_v6  ;;  %v1804_v7 = vand.u32 4294901760, %v1803_v34  ;;  %v1929_v25 = vsub.f32 %v5083_v58, %v5810_v32  ;;  %v5815_v53 = vand.u32 4294901760, %v5089_v61 }
 0x1be   : > { %v5212_v40 = vpack.c.bf16 %v1923_v9, %v1916_v44  ;;  %v1811_v56 = vand.u32 4294901760, %v1810_v3  ;;  %v1936_v10 = vsub.f32 %v5085_v20, %v5813_v31  ;;  %v1817_v27 = vsub.f32 %v5087_v16, %v5814_v36  ;;  %v6204_v16 = vld [vmem:[#allocation12_spill] sm:$0xff] }
 0x1bf   : > { %v1930_v34 = vand.u32 4294901760, %v1929_v25  ;;  %v1824_v3 = vsub.f32 %v5089_v61, %v5815_v53  ;;  %v331_v25 = vlaneseq }
 0x1c0   : > { %v5224_v6 = vpack.c.bf16 %v1811_v56, %v1804_v7  ;;  %v1937_v44 = vand.u32 4294901760, %v1936_v10  ;;  %v1818_v9 = vand.u32 4294901760, %v1817_v27 }
 0x1c1   : > { %v1825_v32 = vand.u32 4294901760, %v1824_v3  ;;  %v332_v3 = vshrl.u32 %v331_v25, 7 }
 0x1c2   : > { %v5229_v26 = vpack.c.bf16 %v1937_v44, %v1930_v34  ;;  %v329_v44 = vld [vmem:[%s5557_s2] sm:$0x3] }
 0x1c3   : > { %v5231_v60 = vpack.c.bf16 %v1825_v32, %v1818_v9  ;;  %v333_v10 = vsub.s32 0, %v332_v3  ;;  %v337_v9 = vsub.s32 1, %v332_v3 }
 0x1c5   : > { %v334_v56 = vrot.slane %v329_v44, %v333_v10  ;;  %v338_v7 = vrot.slane %v329_v44, %v337_v9 }
 0x1c7   : > { %v484_v53 = vadd.f32 %v4975_v1, %v334_v56  ;;  %v486_v32 = vadd.f32 %v4977_v51, %v338_v7  ;;  %v500_v14 = vadd.f32 %v4997_v55, %v334_v56  ;;  %v502_v25 = vadd.f32 %v6204_v16, %v338_v7 }
 0x23d   : > { %v1532_v36 = vpop.f32.mrb[0].mxu0 }
 0x23e   : > { %v3360_v31 = vadd.f32 %v1532_v36, %v484_v53  ;;  %v1534_v27 = vpop.f32.mrb[1].mxu0 }
 0x23f   : > { %v3362_v34 = vadd.f32 %v1534_v27, %v486_v32 }
 0x240   : > { %v1545_v61 = vmax.f32 %v3360_v31, 0.0 }
 0x241   : > { %v1546_v58 = vmax.f32 %v3362_v34, 0.0  ;;  %v1540_v20 = vpop.f32.mrb[2].mxu0 }
 0x242   : > { %v5272_v48 = vand.u32 4294901760, %v1545_v61  ;;  %v3364_v3 = vadd.f32 %v1540_v20, %v500_v14  ;;  %v1542_v10 = vpop.f32.mrb[3].mxu0 }
 0x243   : > { %v5274_v44 = vand.u32 4294901760, %v1546_v58  ;;  %v3366_v1 = vadd.f32 %v1542_v10, %v502_v25 }
 0x244   : > { %v5277_v51 = vsub.f32 %v1545_v61, %v5272_v48  ;;  %v1547_v36 = vmax.f32 %v3364_v3, 0.0 }
 0x245   : > { %v5280_v53 = vsub.f32 %v1546_v58, %v5274_v44  ;;  %v1548_v55 = vmax.f32 %v3366_v1, 0.0 }
 0x246   : > { %v5830_v16 = vand.u32 4294901760, %v5277_v51  ;;  %v5283_v31 = vand.u32 4294901760, %v1547_v36 }
 0x247   : > { %v5285_v7 = vand.u32 4294901760, %v1548_v55  ;;  %v1686_v14 = vand.u32 4294901760, %v5280_v53 }
 0x248   : > { %v1693_v20 = vsub.f32 %v5277_v51, %v5830_v16  ;;  %v5292_v61 = vsub.f32 %v1547_v36, %v5283_v31  ;;  %v6220_v36 = vld [vmem:[#allocation26_spill] sm:$0xff] }
 0x249   : > { %v5295_v56 = vsub.f32 %v1548_v55, %v5285_v7  ;;  %v1687_v58 = vsub.f32 %v5280_v53, %v1686_v14 }
 0x24a   : > { %v5828_v32 = vand.u32 4294901760, %v5292_v61  ;;  %v1694_v9 = vand.u32 4294901760, %v1693_v20  ;;  %v6223_v20 = vld [vmem:[#allocation68_spill] sm:$0xff] }
 0x24b   : > { %v1688_v27 = vand.u32 4294901760, %v1687_v58  ;;  %v5829_v34 = vand.u32 4294901760, %v5295_v56  ;;  %v6224_v58 = vld [vmem:[#allocation27_spill] sm:$0xff] }
 0x24c   : > { %v1708_v25 = vsub.f32 %v5292_v61, %v5828_v32  ;;  %v6246_v32 = vand.u32 4294901760, %v6202_v4 }
 0x24d   : > { %1689 = vmatprep.mubr.f32.mxu1 %v1688_v27  ;;  %v1702_v3 = vsub.f32 %v5295_v56, %v5829_v34  ;;  %v6225_v27 = vpack.c.bf16 %v6223_v20, %v6224_v58  ;;  %v6247_v34 = vand.u32 4294901760, %v6203_v35 }
 0x24e   : > { %1695 = vmatmul.mubr.f32.vlgmr.msra.gmra.mrb[4].mxu1 %v1694_v9  ;;  %v1709_v1 = vand.u32 4294901760, %v1708_v25  ;;  %v6226_v9 = vld [vmem:[#allocation56_spill] sm:$0xff]  ;;  %v6227_v25 = vld [vmem:[#allocation59_spill] sm:$0xff] }
 0x24f   : > { %3202 = vmatpush3.bf16.msra.mxu1 %v5096_v46  ;;  %v1703_v10 = vand.u32 4294901760, %v1702_v3  ;;  %v6205_v46 = vpack.c.bf16 %v6191_v13, %v4791_v50  ;;  %v6228_v3 = vld [vmem:[#allocation61_spill] sm:$0xff]  ;;  %v3299_v16 = vpack.c.bf16 %v6247_v34, %v6246_v32  ;;  %v6261_v34 = vand.u32 4294901760, %v5058_v38 }
 0x250   : > { %3204 = vmatprep.subr.bf16.mxu1 %v5126_v0  ;;  %v6210_v0 = vpack.c.bf16 %v4842_v43, %v4839_v39 }
 0x251   : > { %1704 = vmatprep.mubr.f32.mxu1 %v1703_v10  ;;  %v6229_v10 = vld [vmem:[#allocation64_spill] sm:$0xff] }
 0x252   : > { %1710 = vmatmul.mubr.f32.gmra.mrb[6].mxu1 %v1709_v1  ;;  %v6230_v1 = vld [vmem:[#allocation67_spill] sm:$0xff] }
 0x253   : > { %3206 = vmatpush3.bf16.msra.mxu1 %v5128_v23  ;;  %1940 = vmatprep.mubr.f32.mxu1 %v5274_v44  ;;  %v6211_v23 = vpack.c.bf16 %v4853_v22, %v4844_v30 }
 0x254   : > { %3208 = vmatprep.subr.bf16.mxu1 %v5132_v57  ;;  %v6212_v57 = vpack.c.bf16 %v4936_v28, %v4934_v62 }
 0x257   : > { %3210 = vmatpush3.bf16.msra.mxu1 %v5146_v47  ;;  %v6216_v47 = vpack.c.bf16 %v5073_v63, %v5071_v52 }
 0x258   : > { %3212 = vmatprep.subr.bf16.mxu1 %v5163_v17  ;;  %v6213_v17 = vpack.c.bf16 %v5060_v24, %v5058_v38  ;;  %v6268_v38 = vand.u32 4294901760, %v5073_v63  ;;  %v6275_v63 = vand.u32 4294901760, %v6224_v58  ;;  %v2615_v58 = vld [vmem:[%s5559_s4] ss:$0 sm:$0xff] }
 0x25b   : > { %3214 = vmatpush3.bf16.msra.mxu1 %v5166_v59  ;;  %v6214_v59 = vpack.c.bf16 %v5064_v19, %v5062_v37 }
 0x25c   : > { %3216 = vmatprep.subr.bf16.mxu1 %v5174_v42  ;;  %v6215_v42 = vpack.c.bf16 %v5069_v21, %v5067_v18 }
 0x25f   : > { %3218 = vmatpush3.bf16.msra.mxu1 %v5190_v15  ;;  %v6217_v15 = vpack.c.bf16 %v5077_v29, %v5075_v12 }
 0x260   : > { %3220 = vmatprep.subr.bf16.mxu1 %v5199_v54  ;;  %v6206_v54 = vpack.c.bf16 %v6193_v2, %v6192_v41 }
 0x263   : > { %3222 = vmatpush3.bf16.msra.mxu1 %v5208_v49  ;;  %v6207_v49 = vpack.c.bf16 %v6203_v35, %v6202_v4  ;;  %v6253_v4 = vand.u32 4294901760, %v4837_v11  ;;  %v6254_v35 = vand.u32 4294901760, %v5292_v61 }
 0x264   : > { %3224 = vmatprep.subr.bf16.mxu1 %v5212_v40  ;;  %v6218_v40 = vld [vmem:[#allocation65_spill] sm:$0xff] }
 0x267   : > { %3226 = vmatpush3.bf16.msra.mxu1 %v5224_v6  ;;  %v6219_v6 = vpack.c.bf16 %v5081_v45, %v6218_v40 }
 0x268   : > { %3228 = vmatprep.subr.bf16.mxu1 %v5229_v26  ;;  %v6209_v26 = vpack.c.bf16 %v4837_v11, %v4833_v5  ;;  %v6259_v11 = vand.u32 4294901760, %v4934_v62  ;;  %v6266_v62 = vand.u32 4294901760, %v5069_v21 }
 0x26b   : > { %3230 = vmatpush3.bf16.msra.mxu1 %v5231_v60  ;;  %v6208_v60 = vpack.c.bf16 %v4831_v8, %v4829_v33 }
 0x26c   : > { %3232 = vmatprep.subr.bf16.mxu1 %v6205_v46  ;;  %v6231_v46 = vld [vmem:[#allocation8_spill] sm:$0xff] }
 0x26e   : > { %1942 = vmatmul.mubr.f32.vlgmr.msra.gmra.mrb[8].mxu1 %v5272_v48 }
 0x26f   : > { %1947 = vmatprep.mubr.f32.mxu1 %v5285_v7  ;;  %3234 = vmatpush3.bf16.msra.mxu1 %v6206_v54  ;;  %v6232_v54 = vld [vmem:[#allocation9_spill] sm:$0xff] }
 0x270   : > { %3236 = vmatprep.subr.bf16.mxu1 %v6207_v49  ;;  %v6233_v49 = vld [vmem:[#allocation69_spill] sm:$0xff] }
 0x272   : > { %1949 = vmatmul.mubr.f32.gmra.mrb[10].mxu1 %v5283_v31 }
 0x273   : > { %3238 = vmatpush3.bf16.msra.mxu1 %v6208_v60  ;;  %2084 = vmatprep.mubr.f32.mxu1 %v5280_v53  ;;  %v6221_v53 = vld [vmem:[#allocation66_spill] sm:$0xff]  ;;  %v6234_v60 = vld [vmem:[#allocation72_spill] sm:$0xff] }
 0x274   : > { %3240 = vmatprep.subr.bf16.mxu1 %v6209_v26  ;;  %v6222_v55 = vpack.c.bf16 %v6220_v36, %v6221_v53  ;;  %v6235_v26 = vld [vmem:[#allocation10_spill] sm:$0xff]  ;;  %v6273_v21 = vand.u32 4294901760, %v6221_v53 }
 0x277   : > { %3242 = vmatpush3.bf16.msra.mxu1 %v6210_v0  ;;  %v6236_v0 = vld [vmem:[#allocation11_spill] sm:$0xff] }
 0x278   : > { %3244 = vmatprep.subr.bf16.mxu1 %v6211_v23  ;;  %v6237_v23 = vld [vmem:[#allocation13_spill] sm:$0xff] }
 0x27b   : > { %3246 = vmatpush3.bf16.msra.mxu1 %v6212_v57  ;;  %v6238_v57 = vld [vmem:[#allocation22_spill] sm:$0xff] }
 0x27c   : > { %3248 = vmatprep.subr.bf16.mxu1 %v6213_v17  ;;  %v6239_v17 = vld [vmem:[#allocation23_spill] sm:$0xff] }
 0x27f   : > { %3250 = vmatpush3.bf16.msra.mxu1 %v6214_v59  ;;  %v6241_v59 = vand.u32 4294901760, %v4791_v50  ;;  %v6249_v50 = vand.u32 4294901760, %v5295_v56 }
 0x280   : > { %3252 = vmatprep.subr.bf16.mxu1 %v6215_v42  ;;  %v6242_v42 = vand.u32 4294901760, %v6191_v13  ;;  %v6250_v13 = vand.u32 4294901760, %v4829_v33 }
 0x283   : > { %3254 = vmatpush3.bf16.msra.mxu1 %v6216_v47  ;;  %v3295_v47 = vpack.c.bf16 %v6242_v42, %v6241_v59 }
 0x284   : > { %3256 = vmatprep.subr.bf16.mxu1 %v6217_v15  ;;  %v6243_v15 = vld [vmem:[#allocation25_spill] sm:$0xff] }
 0x287   : > { %3258 = vmatpush3.bf16.msra.mxu1 %v6219_v6  ;;  %v6244_v6 = vand.u32 4294901760, %v6192_v41  ;;  %v6251_v41 = vand.u32 4294901760, %v4831_v8  ;;  %v6257_v8 = vand.u32 4294901760, %v4844_v30  ;;  %v6264_v30 = vand.u32 4294901760, %v5064_v19 }
 0x288   : > { %3260 = vmatprep.subr.bf16.mxu1 %v6222_v55  ;;  %v6245_v55 = vand.u32 4294901760, %v6193_v2  ;;  %v6252_v2 = vand.u32 4294901760, %v4833_v5  ;;  %v6271_v19 = vand.u32 4294901760, %v6218_v40 }
 0x289   : > { %v3301_v59 = vpack.c.bf16 %v6251_v41, %v6250_v13 }
 0x28a   : > { %v3303_v42 = vpack.c.bf16 %v6253_v4, %v6252_v2 }
 0x28b   : > { %3262 = vmatpush3.bf16.msra.mxu1 %v6225_v27  ;;  %v3297_v27 = vpack.c.bf16 %v6245_v55, %v6244_v6 }
 0x28c   : > { %3264 = vmatprep.subr.bf16.mxu1 %v6226_v9 }
 0x28e   : > { %2087 = vmatmul.mubr.f32.vlgmr.msra.gmra.mrb[12].mxu1 %v5277_v51 }
 0x28f   : > { %2093 = vmatprep.mubr.f32.mxu1 %v5295_v56  ;;  %3266 = vmatpush3.bf16.msra.mxu1 %v6227_v25  ;;  %v6256_v56 = vand.u32 4294901760, %v4842_v43  ;;  %v6263_v43 = vand.u32 4294901760, %v5062_v37  ;;  %v6270_v37 = vand.u32 4294901760, %v5077_v29  ;;  %v6277_v29 = vld [vmem:[#allocation24_spill] sm:$0xff] }
 0x290   : > { %3268 = vmatprep.subr.bf16.mxu1 %v6228_v3 }
 0x292   : > { %2096 = vmatmul.mubr.f32.gmra.mrb[14].mxu1 %v5292_v61  ;;  %v6260_v61 = vand.u32 4294901760, %v4936_v28  ;;  %v6267_v28 = vand.u32 4294901760, %v5071_v52  ;;  %v6274_v52 = vand.u32 4294901760, %v6220_v36 }
 0x293   : > { %3270 = vmatpush3.bf16.msra.mxu1 %v6229_v10  ;;  %2200 = vmatprep.mubr.f32.mxu1 %v1686_v14  ;;  %v6240_v14 = vld [vmem:[#allocation24_spill] sm:$0xff] }
 0x294   : > { %3272 = vmatprep.subr.bf16.mxu1 %v6230_v1  ;;  %v3309_v32 = vpack.c.bf16 %v6260_v61, %v6259_v11  ;;  %v3317_v55 = vpack.c.bf16 %v6268_v38, %v6267_v28  ;;  %v3323_v13 = vpack.c.bf16 %v6274_v52, %v6273_v21 }
 0x297   : > { %3274 = vmatpush3.bf16.msra.mxu1 %v6231_v46 }
 0x298   : > { %3276 = vmatprep.subr.bf16.mxu1 %v6232_v54 }
 0x29b   : > { %3278 = vmatpush3.bf16.msra.mxu1 %v6233_v49 }
 0x29c   : > { %3280 = vmatprep.subr.bf16.mxu1 %v6234_v60 }
 0x29f   : > { %3282 = vmatpush3.bf16.msra.mxu1 %v6235_v26 }
 0x2a0   : > { %3284 = vmatprep.subr.bf16.mxu1 %v6236_v0 }
 0x2a3   : > { %3286 = vmatpush3.bf16.msra.mxu1 %v6237_v23 }
 0x2a4   : > { %3288 = vmatprep.subr.bf16.mxu1 %v6238_v57 }
 0x2a7   : > { %3290 = vmatpush3.bf16.msra.mxu1 %v6239_v17 }
 0x2a8   : > { %3292 = vmatprep.subr.bf16.mxu1 %v6240_v14  ;;  %v6248_v14 = vand.u32 4294901760, %v5277_v51  ;;  %v6255_v51 = vand.u32 4294901760, %v4839_v39  ;;  %v6262_v39 = vand.u32 4294901760, %v5060_v24  ;;  %v6269_v24 = vand.u32 4294901760, %v5075_v12 }
 0x2a9   : > { %v6276_v12 = vand.u32 4294901760, %v6223_v20 }
 0x2aa   : > { %v3305_v33 = vpack.c.bf16 %v6256_v56, %v6255_v51 }
 0x2ab   : > { %3294 = vmatpush3.bf16.msra.mxu1 %v6243_v15  ;;  %v3325_v41 = vpack.c.bf16 %v6276_v12, %v6275_v63 }
 0x2ac   : > { %3296 = vmatprep.subr.bf16.mxu1 %v3295_v47  ;;  %v3313_v47 = vpack.c.bf16 %v6264_v30, %v6263_v43 }
 0x2ae   : > { %2204 = vmatmul.mubr.f32.vlgmr.msra.gmra.mrb[16].mxu1 %v6248_v14  ;;  %v3311_v14 = vpack.c.bf16 %v6262_v39, %v6261_v34 }
 0x2af   : > { %2211 = vmatprep.mubr.f32.mxu1 %v6249_v50  ;;  %3298 = vmatpush3.bf16.msra.mxu1 %v3297_v27  ;;  %v3319_v27 = vpack.c.bf16 %v6270_v37, %v6269_v24 }
 0x2b0   : > { %3300 = vmatprep.subr.bf16.mxu1 %v3299_v16  ;;  %v6258_v16 = vand.u32 4294901760, %v4853_v22  ;;  %v6265_v22 = vand.u32 4294901760, %v5067_v18  ;;  %v6272_v18 = vand.u32 4294901760, %v5081_v45 }
 0x2b2   : > { %2215 = vmatmul.mubr.f32.gmra.mrb[18].mxu1 %v6254_v35  ;;  %v3307_v5 = vpack.c.bf16 %v6258_v16, %v6257_v8  ;;  %v3315_v6 = vpack.c.bf16 %v6266_v62, %v6265_v22  ;;  %v3321_v50 = vpack.c.bf16 %v6272_v18, %v6271_v19 }
 0x2b3   : > { %3302 = vmatpush3.bf16.msra.mxu1 %v3301_v59  ;;  %2381 = vmatprep.mubr.f32.mxu1 %v5274_v44 }
 0x2b4   : > { %3304 = vmatprep.subr.bf16.mxu1 %v3303_v42 }
 0x2b7   : > { %3306 = vmatpush3.bf16.msra.mxu1 %v3305_v33 }
 0x2b8   : > { %3308 = vmatprep.subr.bf16.mxu1 %v3307_v5 }
 0x2bb   : > { %3310 = vmatpush3.bf16.msra.mxu1 %v3309_v32 }
 0x2bc   : > { %3312 = vmatprep.subr.bf16.mxu1 %v3311_v14 }
 0x2bf   : > { %3314 = vmatpush3.bf16.msra.mxu1 %v3313_v47 }
 0x2c0   : > { %3316 = vmatprep.subr.bf16.mxu1 %v3315_v6 }
 0x2c3   : > { %3318 = vmatpush3.bf16.msra.mxu1 %v3317_v55 }
 0x2c4   : > { %3320 = vmatprep.subr.bf16.mxu1 %v3319_v27 }
 0x2c7   : > { %3322 = vmatpush3.bf16.msra.mxu1 %v3321_v50 }
 0x2c8   : > { %3324 = vmatprep.subr.bf16.mxu1 %v3323_v13 }
 0x2cb   : > { %3326 = vmatpush3.bf16.msra.mxu1 %v3325_v41 }
 0x2cc   : > { %3328 = vmatprep.subr.bf16.mxu1 %v6226_v9 }
 0x2ce   : > { %2383 = vmatmul.mubr.f32.vlgmr.msra.gmra.mrb[20].mxu1 %v5272_v48 }
 0x2cf   : > { %2388 = vmatprep.mubr.f32.mxu1 %v5285_v7  ;;  %3330 = vmatpush3.bf16.msra.mxu1 %v6227_v25 }
 0x2d0   : > { %3332 = vmatprep.subr.bf16.mxu1 %v6228_v3 }
 0x2d2   : > { %2390 = vmatmul.mubr.f32.gmra.mrb[22].mxu1 %v5283_v31 }
 0x2d3   : > { %3334 = vmatpush3.bf16.msra.mxu1 %v6229_v10  ;;  %2492 = vmatprep.mubr.f32.mxu1 %v5274_v44 }
 0x2d4   : > { %3336 = vmatprep.subr.bf16.mxu1 %v6230_v1 }
 0x2d7   : > { %3338 = vmatpush3.bf16.msra.mxu1 %v6231_v46 }
 0x2d8   : > { %3340 = vmatprep.subr.bf16.mxu1 %v6232_v54 }
 0x2db   : > { %3342 = vmatpush3.bf16.msra.mxu1 %v6233_v49 }
 0x2dc   : > { %3344 = vmatprep.subr.bf16.mxu1 %v6234_v60 }
 0x2df   : > { %3346 = vmatpush3.bf16.msra.mxu1 %v6235_v26 }
 0x2e0   : > { %3348 = vmatprep.subr.bf16.mxu1 %v6236_v0 }
 0x2e3   : > { %3350 = vmatpush3.bf16.msra.mxu1 %v6237_v23 }
 0x2e4   : > { %3352 = vmatprep.subr.bf16.mxu1 %v6238_v57 }
 0x2e7   : > { %3354 = vmatpush3.bf16.msra.mxu1 %v6239_v17 }
 0x2e8   : > { %3356 = vmatprep.subr.bf16.mxu1 %v6277_v29 }
 0x2eb   : > { %3358 = vmatpush3.bf16.msra.mxu1 %v6243_v15 }
 0x2ee   : > { %2494 = vmatmul.mubr.f32.vlgmr.msra.gmra.mrb[24].mxu1 %v5272_v48 }
 0x2ef   : > { %2499 = vmatprep.mubr.f32.mxu1 %v5285_v7 }
 0x2f2   : > { %2501 = vmatmul.mubr.f32.gmra.mrb[26].mxu1 %v5283_v31 }
 0x321   : > { %v2659_v45 = vpop.f32.mrb[4].mxu1 }
 0x322   : > { %v2660_v44 = vpop.f32.mrb[5].mxu1 }
 0x323   : > { %v2661_v40 = vadd.f32 %v2660_v44, %v2659_v45 }
 0x325   : > { %v2662_v36 = vpop.f32.mrb[6].mxu1  ;;  %v1697_v3 = vadd.f32 %v2661_v40, %v2615_v58 }
 0x326   : > { %v2663_v53 = vpop.f32.mrb[7].mxu1 }
 0x327   : > { %v2664_v20 = vadd.f32 %v2663_v53, %v2662_v36 }
 0x329   : > { %v1712_v46 = vadd.f32 %v2664_v20, %v2615_v58 }
 0x341   : > { %v2697_v9 = vpop.f32.mrb[8].mxu1 }
 0x342   : > { %v2698_v25 = vpop.f32.mrb[9].mxu1 }
 0x343   : > { %v2699_v10 = vadd.f32 %v2698_v25, %v2697_v9 }
 0x345   : > { %v1944_v48 = vadd.f32 %v2699_v10, %v1697_v3  ;;  %v2700_v1 = vpop.f32.mrb[10].mxu1 }
 0x346   : > { %v2701_v7 = vpop.f32.mrb[11].mxu1 }
 0x347   : > { %v2702_v31 = vadd.f32 %v2701_v7, %v2700_v1 }
 0x349   : > { %v1951_v54 = vadd.f32 %v2702_v31, %v1712_v46 }
 0x361   : > { %v2735_v49 = vpop.f32.mrb[12].mxu1 }
 0x362   : > { %v2736_v60 = vpop.f32.mrb[13].mxu1 }
 0x363   : > { %v2737_v26 = vadd.f32 %v2736_v60, %v2735_v49 }
 0x365   : > { %v2089_v0 = vadd.f32 %v2737_v26, %v1944_v48  ;;  %v2738_v23 = vpop.f32.mrb[14].mxu1 }
 0x366   : > { %v2739_v57 = vpop.f32.mrb[15].mxu1 }
 0x367   : > { %v2740_v17 = vadd.f32 %v2739_v57, %v2738_v23 }
 0x369   : > { %v2098_v15 = vadd.f32 %v2740_v17, %v1951_v54 }
 0x381   : > { %v2773_v59 = vpop.f32.mrb[16].mxu1 }
 0x382   : > { %v2774_v2 = vpop.f32.mrb[17].mxu1 }
 0x383   : > { %v2775_v4 = vadd.f32 %v2774_v2, %v2773_v59 }
 0x385   : > { %v2206_v42 = vadd.f32 %v2775_v4, %v2089_v0  ;;  %v2776_v35 = vpop.f32.mrb[18].mxu1 }
 0x386   : > { %v2777_v51 = vpop.f32.mrb[19].mxu1 }
 0x387   : > { %v2778_v56 = vadd.f32 %v2777_v51, %v2776_v35 }
 0x389   : > { %v2217_v33 = vadd.f32 %v2778_v56, %v2098_v15 }
 0x3a1   : > { %v2811_v8 = vpop.f32.mrb[20].mxu1 }
 0x3a2   : > { %v2812_v16 = vpop.f32.mrb[21].mxu1 }
 0x3a3   : > { %v2813_v5 = vadd.f32 %v2812_v16, %v2811_v8 }
 0x3a5   : > { %v2385_v11 = vadd.f32 %v2813_v5, %v2206_v42  ;;  %v2814_v61 = vpop.f32.mrb[22].mxu1 }
 0x3a6   : > { %v2815_v32 = vpop.f32.mrb[23].mxu1 }
 0x3a7   : > { %v2816_v34 = vadd.f32 %v2815_v32, %v2814_v61 }
 0x3a9   : > { %v2392_v39 = vadd.f32 %v2816_v34, %v2217_v33 }
 0x3c1   : > { %v2849_v14 = vpop.f32.mrb[24].mxu1 }
 0x3c2   : > { %v2850_v43 = vpop.f32.mrb[25].mxu1 }
 0x3c3   : > { %v2851_v30 = vadd.f32 %v2850_v43, %v2849_v14 }
 0x3c5   : > { %v2496_v47 = vadd.f32 %v2851_v30, %v2385_v11  ;;  %v2852_v22 = vpop.f32.mrb[26].mxu1 }
 0x3c6   : > { %v2853_v62 = vpop.f32.mrb[27].mxu1 }
 0x3c7   : > { %3436 = vtanh.f32 %v2496_v47  ;;  %v2854_v6 = vadd.f32 %v2853_v62, %v2852_v22 }
 0x3c9   : > { %v2503_v28 = vadd.f32 %v2854_v6, %v2392_v39 }
 0x3cb   : > { %3438 = vtanh.f32 %v2503_v28 }
 0x3d0   : > { %2518 = sbr.rel (!%p6278_p6) target bundleno = 1011 (0x3f3), region = 48 }
 0x3d1   : > { %v3437_v38 = vpop.eup %3436 }
 0x3d2   : > { %2509 = vst.msk [vmem:[%s250_s6] sm:$0xff] %vm2508_vm2, %v3437_v38 }
 0x3d5   : > { %v3439_v55 = vpop.eup %3438 }
 0x3d6   : > { %2510 = vst.msk [vmem:[%s250_s6 + $0x8] sm:$0xff] %vm2508_vm2, %v3439_v55 }
 0x3d7   : > { %s6285_s8 = smov (!%p2521_p9, %s2520_s8), 2 }
 0x3d8   : > { %s5500_s9 = sshll.u32 %s6285_s8, 7 }
 0x3d9   : > { %s2525_s10 = ssub.s32 256, %s5500_s9 }
 0x3da   : > { %2526 = vsyncadd %s5495_s7, %s2525_s10  ;;  %p2619_p10 = scmp.ne.s32.totalorder %s5500_s9, 0  ;;  %s2626_s11 = sshll.u32 %s3593_s22, 8 }
 0x3db   : > { %s5509_s28 = scalar_lea.hbm %s5560_s5, %s2626_s11  ;;  %s2531_s14 = sshll.u32 %s250_s6, 4  ;;  %s5511_s14 = int_to_ptr.vmem [resolvable:$true] %s2531_s14 }
 0x3dc   : > { %s3468_s30 = scalar_lea.vmem %s5511_s14, %s5500_s9  ;;  %s3539_s15 = smov [#allocation5]  }
 0x3dd   : > { %p3469_p12 = scmp.ne.s32.totalorder %s5511_s14, %s3468_s30  ;;  %s3472_s16 = sshll.u32 %s3539_s15, 4  ;;  %s3473_s16 = int_to_ptr.vmem [resolvable:$false] %s3472_s16 }
 0x3de   : > { %s3474_s22 = scalar_lea.vmem %s3473_s16, 512  ;;  %p3475_p4 = scmp.lt.s32.totalorder %s5511_s14, %s3473_s16 }
 0x3df   : > { %p3470_p2 = pnand %p3469_p12, %p2619_p10  ;;  %p3476_p7 = scmp.lt.s32.totalorder %s3474_s22, %s3468_s30 }
 0x3e1   : > { %p3471_p3 = pneg %p3470_p2  ;;  %p3477_p8 = por %p3476_p7, %p3475_p4 }
 0x3e3   : > { %p3478_p11 = pnand %p3477_p8, %p3471_p3 }
 0x3e5   : > { %3481 = shalt.err (!%p3478_p11)
}
 0x3e6   : > { %s3482_s17 = scalar_lea.hbm %s5509_s28, %s5500_s9  ;;  %s3486_s26 = scalar_lea.hbm %s5560_s5, 384 }
 0x3e7   : > { %p3483_p13 = scmp.ne.s32.totalorder %s5509_s28, %s3482_s17  ;;  %p3487_p5 = scmp.lt.u32.totalorder %s5509_s28, %s5560_s5 }
 0x3e8   : > { %p3488_p6 = scmp.lt.u32.totalorder %s3486_s26, %s3482_s17  ;;  %p3490_p12 = scmp.lt.u32.totalorder %s3482_s17, %s5509_s28 }
 0x3e9   : > { %p3484_p1 = pnand %p3483_p13, %p2619_p10 }
 0x3ea   : > { %p3489_p9 = por %p3488_p6, %p3487_p5 }
 0x3eb   : > { %p3485_p0 = pneg %p3484_p1 }
 0x3ec   : > { %p3491_p2 = por %p3490_p12, %p3489_p9 }
 0x3ee   : > { %p3492_p3 = pnand %p3491_p2, %p3485_p0 }
 0x3f0   : > { %3495 = shalt.err (!%p3492_p3)
}
 0x3f1   : > { %s3540_s10 = smov 128   ;;  %s3541_s11 = smov 8  }
 0x3f2   : > { %2537 = dma.vmem_to_hbm [thread:$0]  (%p2619_p10), %s5511_s14, %s5500_s9, %s5509_s28, %s5495_s7, %s3540_s10, %s3540_s10, %s3541_s11  }
 0x3f3 PF: > { %p3398_p4 = scmp.ge.s32.totalorder %s3534_s21, 2  ;;  %s2546_s12 = sand.u32 1, %s3522_s18  }
 0x3f4   : > { %p6279_p7 = scmp.ne.s32.totalorder %s5832_s29, 0  ;;  %s2547_s13 = scalar_lea.sflag [#allocation4], %s2546_s12 }
 0x3f6   : > { %p3393_p8 = pnand %p3398_p4, %p6279_p7 }
 0x3f8   : > { %3517 = dma.done.wait (!%p3393_p8), %s2547_s13, 256  }
 0x3f9   : > { %3519 = vsyncadd (!%p3393_p8), %s2547_s13, 4294967040  ;;  %p16_p11 = scmp.ge.s32.totalorder %s3597_s24, 4   ;;  %s6280_s18 = smov %s3526_s19 }
 0x3fa   : > { %s6281_s19 = smov %s3530_s20  ;;  %s6282_s20 = smov %s3608_s27 }
 0x3fb   : > { %s6283_s21 = smov %s3597_s24  ;;  %18 = sbr.rel (!%p16_p11) target bundleno = 4 (0x4), region = 80 }
 0x402   :  { %2552 = vsyncpa [#allocation3], 1 }
 0x403   :  { %2554 = vsyncpa [#allocation3 + $0x1], 1 }
 0x404   :  { %2555 = vsyncpa [#allocation4], 1 }
 0x405   :  { %2557 = vsyncpa [#allocation4 + $0x1], 1 }

</bundles_post_ra>
